<compile_context>
chip_gen: v7x
topology: tpu7x:2x2x1
jax: 0.10.0
libtpu: 0.0.40
codegen_flags: <defaults>
</compile_context>

<pallas_src>
import functools

import jax
import jax.numpy as jnp
from jax import lax
from jax.experimental import pallas as pl
from jax.experimental.pallas import tpu as pltpu


def _linear_attention_kernel(
    x_ref, wqkv_ref, wout_ref, bout_ref, gamma_ref, beta_ref, mask_ref,
    o_ref, *, heads, d_head, eps, matmul_dtype,
):
    """One grid step = one batch element.

    x_ref:     (1, C, N)         input, spatial-last
    wqkv_ref:  (3*hidden, C)     fused Wq/Wk/Wv (1x1 convs, no bias)
    wout_ref:  (C, hidden)       to_out[0] weight
    bout_ref:  (C, 1)            to_out[0] bias
    gamma_ref: (C, 1)            GroupNorm(num_groups=1) weight
    beta_ref:  (C, 1)            GroupNorm(num_groups=1) bias
    mask_ref:  (hidden, hidden)  block-diagonal head mask (ones on DxD blocks)
    o_ref:     (1, C, N)
    """
    hidden = heads * d_head
    scale = d_head ** (-0.5)

    x = x_ref[0].astype(jnp.float32)                       # (C, N)
    mask = mask_ref[...]                                   # (hidden, hidden)

    # Fused q/k/v projection: one (3*hidden, C) @ (C, N) MXU push instead of 3.
    qkv = jnp.dot(
        wqkv_ref[...].astype(matmul_dtype), x.astype(matmul_dtype),
        preferred_element_type=jnp.float32,
    )                                                      # (3*hidden, N)
    q = qkv[0 * hidden:1 * hidden, :]                      # (hidden, N)
    k = qkv[1 * hidden:2 * hidden, :]
    v = qkv[2 * hidden:3 * hidden, :]

    # q softmax over head channels (torch dim=-2), per spatial position & head.
    # Shift by the per-position max over all heads (softmax is shift-invariant
    # as long as the shift is constant within a head segment, which a
    # per-column scalar is), then get per-head segment sums with a single
    # block-diagonal matmul on the MXU instead of segmented 32-wide
    # cross-sublane reductions on the XLU.
    q_max = jnp.max(q, axis=0, keepdims=True)              # (1, N)
    eq = jnp.exp(q - q_max)                                # (hidden, N)
    seg_sum = jnp.dot(mask, eq, preferred_element_type=jnp.float32)   # (hidden, N)
    q_soft = eq * pl.reciprocal(seg_sum, approx=True)      # (hidden, N)

    # k softmax over the spatial axis (torch dim=-1), per channel.
    k_max = jnp.max(k, axis=-1, keepdims=True)             # (hidden, 1)
    ek = jnp.exp(k - k_max)
    k_den = jnp.sum(ek, axis=-1, keepdims=True)            # (hidden, 1)
    k_soft = ek * pl.reciprocal(k_den, approx=True)

    # context = k @ v^T per head, done as ONE full (hidden, hidden) matmul
    # contracting the spatial axis directly (no explicit transpose); zero the
    # cross-head DxD blocks with the precomputed mask.  The softmax scale is
    # folded into the tiny (hidden, hidden) context instead of the (hidden, N) q.
    context = lax.dot_general(
        k_soft, v, (((1,), (1,)), ((), ())),
        preferred_element_type=jnp.float32,
    )                                                      # (hidden, hidden)
    context = context * (mask * scale)

    # output = context^T @ q per head, again one full-width matmul.
    attn = lax.dot_general(
        context, q_soft, (((0,), (0,)), ((), ())),
        preferred_element_type=jnp.float32,
    )                                                      # (hidden, N)

    # to_out[0]: 1x1 conv with bias.
    y = jnp.dot(
        wout_ref[...].astype(matmul_dtype), attn.astype(matmul_dtype),
        preferred_element_type=jnp.float32,
    )                                                      # (C, N)
    y = y + bout_ref[...]

    # to_out[1]: GroupNorm(num_groups=1) -> normalize over all (C, N) of the
    # sample (biased variance), then per-channel affine.
    mean = jnp.mean(y)
    var = jnp.mean((y - mean) ** 2)
    y_norm = (y - mean) * lax.rsqrt(var + eps)
    y_norm = y_norm * gamma_ref[...] + beta_ref[...]

    # Residual connection (part of the module forward: `self.to_out(...) + x`).
    o_ref[0] = (y_norm + x).astype(o_ref.dtype)


def linear_attention_forward(x_nchw, params, *, heads, d_head, eps=1e-5,
                             matmul_dtype=jnp.float32):
    """x_nchw: (B, C, H, W). Returns (B, C, H, W).

    Set matmul_dtype=jnp.bfloat16 on v6e/v7x to halve matmul-input DMA/VMEM
    bytes (softmax / GroupNorm math stays in f32 either way).
    """
    B, C, H, W = x_nchw.shape
    N = H * W
    hidden = heads * d_head

    # NCHW -> (B, C, N): pure reshape, no transpose / extra HBM traffic.
    x_bcn = x_nchw.reshape(B, C, N)

    # Fuse the three projection weights into one (3*hidden, C) matrix.
    wqkv = jnp.concatenate([params["wq"], params["wk"], params["wv"]], axis=0)

    # Block-diagonal head mask, built once outside the kernel (JAX does not
    # CSE iota/broadcast, so we never rebuild it per grid step / per head).
    head_id = jnp.arange(hidden, dtype=jnp.int32) // d_head
    head_mask = (head_id[:, None] == head_id[None, :]).astype(jnp.float32)

    bout = params["bout"].reshape(C, 1)
    gamma = params["gamma"].reshape(C, 1)
    beta = params["beta"].reshape(C, 1)

    kernel = functools.partial(
        _linear_attention_kernel,
        heads=heads, d_head=d_head, eps=eps, matmul_dtype=matmul_dtype,
    )

    # Rough per-step VMEM footprint (double-buffered in/out blocks + resident
    # weights + f32 intermediates); request a scoped-VMEM limit with headroom,
    # capped at 64 MiB so it stays within v7x's physical VMEM.
    # TODO(synk): for very large N (e.g. N >= 8K on v7x/v5e) tile N inside the
    # kernel (two-pass: k-stats/context, then q-side + projection + GroupNorm)
    # and add a second parallel grid axis so both v7x TensorCores stay busy
    # when B is small.
    est_bytes = 4 * (
        2 * 2 * C * N                                        # in/out blocks (x2 buffers)
        + 2 * (4 * hidden * C + 3 * C + hidden * hidden)     # weights + mask
        + (10 * hidden * N + 2 * hidden * hidden + 4 * C * N)  # intermediates
    )
    vmem_limit = int(min(max(2 * est_bytes, 32 * 1024 * 1024), 64 * 1024 * 1024))

    out_bcn = pl.pallas_call(
        kernel,
        out_shape=jax.ShapeDtypeStruct((B, C, N), x_bcn.dtype),
        grid_spec=pltpu.PrefetchScalarGridSpec(
            num_scalar_prefetch=0,
            grid=(B,),
            in_specs=[
                pl.BlockSpec((1, C, N), lambda b: (b, 0, 0)),        # x
                pl.BlockSpec((3 * hidden, C), lambda b: (0, 0)),     # Wqkv (fused)
                pl.BlockSpec((C, hidden), lambda b: (0, 0)),         # Wout
                pl.BlockSpec((C, 1), lambda b: (0, 0)),              # bout
                pl.BlockSpec((C, 1), lambda b: (0, 0)),              # gamma
                pl.BlockSpec((C, 1), lambda b: (0, 0)),              # beta
                pl.BlockSpec((hidden, hidden), lambda b: (0, 0)),    # head mask
            ],
            out_specs=pl.BlockSpec((1, C, N), lambda b: (b, 0, 0)),
        ),
        compiler_params=pltpu.CompilerParams(
            dimension_semantics=("parallel",),
            vmem_limit_bytes=vmem_limit,
        ),
    )(x_bcn, wqkv, params["wout"], bout, gamma, beta, head_mask)

    # (B, C, N) -> (B, C, H, W): again a pure reshape, no transpose.
    return out_bcn.reshape(B, C, H, W)


def init_params(key, dim, heads, d_head):
    hidden = heads * d_head
    k1, k2, k3, k4, k5 = jax.random.split(key, 5)
    scale_in = 1.0 / (dim ** 0.5)
    scale_hid = 1.0 / (hidden ** 0.5)
    return {
        # 1x1 conv weights stored as (out_channels, in_channels) matrices,
        # matching PyTorch Conv2d weight[..., 0, 0] layout.
        "wq": jax.random.normal(k1, (hidden, dim), jnp.float32) * scale_in,
        "wk": jax.random.normal(k2, (hidden, dim), jnp.float32) * scale_in,
        "wv": jax.random.normal(k3, (hidden, dim), jnp.float32) * scale_in,
        "wout": jax.random.normal(k4, (dim, hidden), jnp.float32) * scale_hid,
        "bout": jax.random.normal(k5, (dim,), jnp.float32) * 0.01,
        # GroupNorm affine defaults (weight=1, bias=0).
        "gamma": jnp.ones((dim,), jnp.float32),
        "beta": jnp.zeros((dim,), jnp.float32),
    }


if __name__ == "__main__":
    # Small, module-consistent shapes: dim=8 input channels; module defaults
    # heads=4, num_head_channels=32 -> hidden_dim=128; 16x16 spatial -> N=256.
    B, DIM, H, W = 2, 8, 16, 16
    HEADS, D_HEAD = 4, 32

    key = jax.random.PRNGKey(0)
    kx, kp = jax.random.split(key)
    x = jax.random.normal(kx, (B, DIM, H, W), jnp.float32)
    params = init_params(kp, DIM, HEADS, D_HEAD)

    out = linear_attention_forward(x, params, heads=HEADS, d_head=D_HEAD)
    out = jax.block_until_ready(out)

    assert out.shape == (B, DIM, H, W), out.shape
    assert bool(jnp.all(jnp.isfinite(out)))
    print("KERNEL_OK")
</pallas_src>

<mosaic_0001>
module attributes {stable_mosaic.version = 11 : i64} {
  func.func @_linear_attention_kernel(%arg0: i32, %arg1: memref<1x8x256xf32, #tpu.memory_space<vmem>>, %arg2: memref<384x8xf32, #tpu.memory_space<vmem>>, %arg3: memref<8x128xf32, #tpu.memory_space<vmem>>, %arg4: memref<8x1xf32, #tpu.memory_space<vmem>>, %arg5: memref<8x1xf32, #tpu.memory_space<vmem>>, %arg6: memref<8x1xf32, #tpu.memory_space<vmem>>, %arg7: memref<128x128xf32, #tpu.memory_space<vmem>>, %arg8: memref<1x8x256xf32, #tpu.memory_space<vmem>>) attributes {dimension_semantics = [#tpu.dimension_semantics<parallel>], iteration_bounds = array<i64: 2>, scalar_prefetch = 0 : i64, scratch_operands = 0 : i64, tpu.core_type = #tpu.core_type<tc>, window_params = [{transform_indices = @transform_0, window_bounds = array<i64: 1, 8, 256>}, {pipeline_mode = #tpu.pipeline_mode<synchronous>, transform_indices = @transform_1, window_bounds = array<i64: 384, 8>}, {pipeline_mode = #tpu.pipeline_mode<synchronous>, transform_indices = @transform_2, window_bounds = array<i64: 8, 128>}, {pipeline_mode = #tpu.pipeline_mode<synchronous>, transform_indices = @transform_3, window_bounds = array<i64: 8, 1>}, {pipeline_mode = #tpu.pipeline_mode<synchronous>, transform_indices = @transform_4, window_bounds = array<i64: 8, 1>}, {pipeline_mode = #tpu.pipeline_mode<synchronous>, transform_indices = @transform_5, window_bounds = array<i64: 8, 1>}, {pipeline_mode = #tpu.pipeline_mode<synchronous>, transform_indices = @transform_6, window_bounds = array<i64: 128, 128>}, {transform_indices = @transform_7, window_bounds = array<i64: 1, 8, 256>}]} {
    %c0 = arith.constant 0 : index
    %c0_0 = arith.constant 0 : index
    %c0_1 = arith.constant 0 : index
    %0 = vector.load %arg1[%c0, %c0_0, %c0_1] : memref<1x8x256xf32, #tpu.memory_space<vmem>>, vector<1x8x256xf32>
    %1 = vector.shape_cast %0 : vector<1x8x256xf32> to vector<8x256xf32>
    %c0_2 = arith.constant 0 : index
    %c0_3 = arith.constant 0 : index
    %2 = vector.load %arg7[%c0_2, %c0_3] : memref<128x128xf32, #tpu.memory_space<vmem>>, vector<128x128xf32>
    %c0_4 = arith.constant 0 : index
    %c0_5 = arith.constant 0 : index
    %3 = vector.load %arg2[%c0_4, %c0_5] : memref<384x8xf32, #tpu.memory_space<vmem>>, vector<384x8xf32>
    %cst = arith.constant dense<0.000000e+00> : vector<384x256xf32>
    %4 = tpu.matmul %3, %1, %cst {dimension_numbers = #tpu.dot_dimension_numbers<[1], [0], [0], [1], [0, 0, 1, 1], [], []>} : vector<384x8xf32>, vector<8x256xf32>, vector<384x256xf32> -> vector<384x256xf32>
    %5 = vector.extract_strided_slice %4 {offsets = [0, 0], sizes = [128, 256], strides = [1, 1]} : vector<384x256xf32> to vector<128x256xf32>
    %6 = vector.extract_strided_slice %4 {offsets = [128, 0], sizes = [128, 256], strides = [1, 1]} : vector<384x256xf32> to vector<128x256xf32>
    %7 = vector.extract_strided_slice %4 {offsets = [256, 0], sizes = [128, 256], strides = [1, 1]} : vector<384x256xf32> to vector<128x256xf32>
    %cst_6 = arith.constant dense<0xFF800000> : vector<256xf32>
    %8 = vector.multi_reduction <maximumf>, %5, %cst_6 [0] : vector<128x256xf32> to vector<256xf32>
    %9 = vector.shape_cast %8 : vector<256xf32> to vector<1x256xf32>
    %10 = vector.broadcast %9 : vector<1x256xf32> to vector<128x256xf32>
    %11 = arith.subf %5, %10 : vector<128x256xf32>
    %12 = math.exp %11 : vector<128x256xf32>
    %cst_7 = arith.constant dense<0.000000e+00> : vector<128x256xf32>
    %13 = tpu.matmul %2, %12, %cst_7 {dimension_numbers = #tpu.dot_dimension_numbers<[1], [0], [0], [1], [0, 0, 1, 1], [], []>} : vector<128x128xf32>, vector<128x256xf32>, vector<128x256xf32> -> vector<128x256xf32>
    %14 = tpu.reciprocal %13 {approx = true} : vector<128x256xf32> -> vector<128x256xf32>
    %15 = arith.mulf %12, %14 : vector<128x256xf32>
    %cst_8 = arith.constant dense<0xFF800000> : vector<128xf32>
    %16 = vector.multi_reduction <maximumf>, %6, %cst_8 [1] : vector<128x256xf32> to vector<128xf32>
    %17 = vector.shape_cast %16 : vector<128xf32> to vector<128x1xf32>
    %18 = vector.broadcast %17 : vector<128x1xf32> to vector<128x256xf32>
    %19 = arith.subf %6, %18 : vector<128x256xf32>
    %20 = math.exp %19 : vector<128x256xf32>
    %cst_9 = arith.constant dense<0.000000e+00> : vector<128xf32>
    %21 = vector.multi_reduction <add>, %20, %cst_9 [1] : vector<128x256xf32> to vector<128xf32>
    %22 = vector.shape_cast %21 : vector<128xf32> to vector<128x1xf32>
    %23 = tpu.reciprocal %22 {approx = true} : vector<128x1xf32> -> vector<128x1xf32>
    %24 = vector.broadcast %23 : vector<128x1xf32> to vector<128x256xf32>
    %25 = arith.mulf %20, %24 : vector<128x256xf32>
    %cst_10 = arith.constant dense<0.000000e+00> : vector<128x128xf32>
    %26 = tpu.matmul %25, %7, %cst_10 {dimension_numbers = #tpu.dot_dimension_numbers<[1], [1], [0], [0], [0, 0, 1, 0], [], []>} : vector<128x256xf32>, vector<128x256xf32>, vector<128x128xf32> -> vector<128x128xf32>
    %cst_11 = arith.constant 0.176776692 : f32
    %27 = vector.broadcast %cst_11 : f32 to vector<128x128xf32>
    %28 = arith.mulf %2, %27 : vector<128x128xf32>
    %29 = arith.mulf %26, %28 : vector<128x128xf32>
    %cst_12 = arith.constant dense<0.000000e+00> : vector<128x256xf32>
    %30 = tpu.matmul %29, %15, %cst_12 {dimension_numbers = #tpu.dot_dimension_numbers<[0], [0], [1], [1], [0, 1, 1, 1], [], []>} : vector<128x128xf32>, vector<128x256xf32>, vector<128x256xf32> -> vector<128x256xf32>
    %c0_13 = arith.constant 0 : index
    %c0_14 = arith.constant 0 : index
    %31 = vector.load %arg3[%c0_13, %c0_14] : memref<8x128xf32, #tpu.memory_space<vmem>>, vector<8x128xf32>
    %cst_15 = arith.constant dense<0.000000e+00> : vector<8x256xf32>
    %32 = tpu.matmul %31, %30, %cst_15 {dimension_numbers = #tpu.dot_dimension_numbers<[1], [0], [0], [1], [0, 0, 1, 1], [], []>} : vector<8x128xf32>, vector<128x256xf32>, vector<8x256xf32> -> vector<8x256xf32>
    %c0_16 = arith.constant 0 : index
    %c0_17 = arith.constant 0 : index
    %33 = vector.load %arg4[%c0_16, %c0_17] : memref<8x1xf32, #tpu.memory_space<vmem>>, vector<8x1xf32>
    %34 = vector.broadcast %33 : vector<8x1xf32> to vector<8x256xf32>
    %35 = arith.addf %32, %34 : vector<8x256xf32>
    %36 = vector.shape_cast %35 : vector<8x256xf32> to vector<1x8x256xf32>
    %cst_18 = arith.constant dense<0.000000e+00> : vector<1xf32>
    %37 = vector.multi_reduction <add>, %36, %cst_18 [1, 2] : vector<1x8x256xf32> to vector<1xf32>
    %38 = vector.shape_cast %37 : vector<1xf32> to vector<1x1x1xf32>
    %39 = vector.extract %38[0, 0, 0] : f32 from vector<1x1x1xf32>
    %cst_19 = arith.constant 2.048000e+03 : f32
    %40 = arith.divf %39, %cst_19 : f32
    %41 = vector.broadcast %40 : f32 to vector<8x256xf32>
    %42 = arith.subf %35, %41 : vector<8x256xf32>
    %43 = arith.mulf %42, %42 : vector<8x256xf32>
    %44 = vector.shape_cast %43 : vector<8x256xf32> to vector<1x8x256xf32>
    %cst_20 = arith.constant dense<0.000000e+00> : vector<1xf32>
    %45 = vector.multi_reduction <add>, %44, %cst_20 [1, 2] : vector<1x8x256xf32> to vector<1xf32>
    %46 = vector.shape_cast %45 : vector<1xf32> to vector<1x1x1xf32>
    %47 = vector.extract %46[0, 0, 0] : f32 from vector<1x1x1xf32>
    %cst_21 = arith.constant 2.048000e+03 : f32
    %48 = arith.divf %47, %cst_21 : f32
    %49 = vector.broadcast %40 : f32 to vector<8x256xf32>
    %50 = arith.subf %35, %49 : vector<8x256xf32>
    %cst_22 = arith.constant 9.99999974E-6 : f32
    %51 = arith.addf %48, %cst_22 : f32
    %52 = math.rsqrt %51 : f32
    %53 = vector.broadcast %52 : f32 to vector<8x256xf32>
    %54 = arith.mulf %50, %53 : vector<8x256xf32>
    %c0_23 = arith.constant 0 : index
    %c0_24 = arith.constant 0 : index
    %55 = vector.load %arg5[%c0_23, %c0_24] : memref<8x1xf32, #tpu.memory_space<vmem>>, vector<8x1xf32>
    %56 = vector.broadcast %55 : vector<8x1xf32> to vector<8x256xf32>
    %57 = arith.mulf %54, %56 : vector<8x256xf32>
    %c0_25 = arith.constant 0 : index
    %c0_26 = arith.constant 0 : index
    %58 = vector.load %arg6[%c0_25, %c0_26] : memref<8x1xf32, #tpu.memory_space<vmem>>, vector<8x1xf32>
    %59 = vector.broadcast %58 : vector<8x1xf32> to vector<8x256xf32>
    %60 = arith.addf %57, %59 : vector<8x256xf32>
    %61 = arith.addf %60, %1 : vector<8x256xf32>
    %c0_27 = arith.constant 0 : index
    %c0_28 = arith.constant 0 : index
    %c0_29 = arith.constant 0 : index
    %62 = vector.load %arg8[%c0_27, %c0_28, %c0_29] : memref<1x8x256xf32, #tpu.memory_space<vmem>>, vector<1x8x256xf32>
    %63 = vector.shape_cast %62 : vector<1x8x256xf32> to vector<8x256xf32>
    %64 = vector.shape_cast %61 : vector<8x256xf32> to vector<1x8x256xf32>
    tpu.vector_store %arg8[%c0_27, %c0_28, %c0_29], %64 {strides = array<i32>} : memref<1x8x256xf32, #tpu.memory_space<vmem>>, vector<1x8x256xf32>,
    return
  }
  func.func @transform_0(%arg0: i32) -> (i32, i32, i32) {
    %c0_i32 = arith.constant 0 : i32
    %c0_i32_0 = arith.constant 0 : i32
    %c0_i32_1 = arith.constant 0 : i32
    return %arg0, %c0_i32, %c0_i32_0 : i32, i32, i32
  }
  func.func @transform_1(%arg0: i32) -> (i32, i32) {
    %c0_i32 = arith.constant 0 : i32
    %c0_i32_0 = arith.constant 0 : i32
    %c0_i32_1 = arith.constant 0 : i32
    return %c0_i32, %c0_i32_0 : i32, i32
  }
  func.func @transform_2(%arg0: i32) -> (i32, i32) {
    %c0_i32 = arith.constant 0 : i32
    %c0_i32_0 = arith.constant 0 : i32
    %c0_i32_1 = arith.constant 0 : i32
    return %c0_i32, %c0_i32_0 : i32, i32
  }
  func.func @transform_3(%arg0: i32) -> (i32, i32) {
    %c0_i32 = arith.constant 0 : i32
    %c0_i32_0 = arith.constant 0 : i32
    %c0_i32_1 = arith.constant 0 : i32
    return %c0_i32, %c0_i32_0 : i32, i32
  }
  func.func @transform_4(%arg0: i32) -> (i32, i32) {
    %c0_i32 = arith.constant 0 : i32
    %c0_i32_0 = arith.constant 0 : i32
    %c0_i32_1 = arith.constant 0 : i32
    return %c0_i32, %c0_i32_0 : i32, i32
  }
  func.func @transform_5(%arg0: i32) -> (i32, i32) {
    %c0_i32 = arith.constant 0 : i32
    %c0_i32_0 = arith.constant 0 : i32
    %c0_i32_1 = arith.constant 0 : i32
    return %c0_i32, %c0_i32_0 : i32, i32
  }
  func.func @transform_6(%arg0: i32) -> (i32, i32) {
    %c0_i32 = arith.constant 0 : i32
    %c0_i32_0 = arith.constant 0 : i32
    %c0_i32_1 = arith.constant 0 : i32
    return %c0_i32, %c0_i32_0 : i32, i32
  }
  func.func @transform_7(%arg0: i32) -> (i32, i32, i32) {
    %c0_i32 = arith.constant 0 : i32
    %c0_i32_0 = arith.constant 0 : i32
    %c0_i32_1 = arith.constant 0 : i32
    return %arg0, %c0_i32, %c0_i32_0 : i32, i32, i32
  }
}

</mosaic_0001>

<bundles_post_ra>
// kernel: tpu_custom_call.1
= control target key start
LH: loop header
LB: loop body
LE: loop exit
PB: predicated region body
PF: predicated region fallthrough
CT: control target
= control target key end

     0   :  { %12 = vsyncpa [#allocation3], 0  ;;  %s3692_s0 = inlined_call_operand.vmem [shape: f32[2,8,256], index: 0, kind: input, shape index: {}]   ;;  %s3693_s1 = inlined_call_operand.vmem [shape: f32[384,8], index: 1, kind: input, shape index: {}]   ;;  %s3694_s2 = inlined_call_operand.vmem [shape: f32[8,128], index: 2, kind: input, shape index: {}]   ;;  %s3695_s3 = inlined_call_operand.vmem [shape: f32[8,1], index: 3, kind: input, shape index: {}]   ;;  %s3696_s4 = inlined_call_operand.vmem [shape: f32[8,1], index: 4, kind: input, shape index: {}]   ;;  %s3697_s5 = inlined_call_operand.vmem [shape: f32[8,1], index: 5, kind: input, shape index: {}]   ;;  %s3698_s6 = inlined_call_operand.vmem [shape: f32[128,128], index: 6, kind: input, shape index: {}]   ;;  %s3699_s7 = inlined_call_operand.hbm [shape: f32[2,8,256], index: 7, kind: output, shape index: {}]  }
   0x1   :  { %14 = vsyncpa [#allocation3 + $0x1], 0  ;;  %s2614_s24 = smov 0   ;;  %s2616_s25 = smov 0  }
   0x2   :  { %s2618_s26 = smov 0   ;;  %s2620_s27 = smov 0  }
   0x3 LB: > { %s2635_s28 = sadd.s32 4294967295, %s2569_s27   ;;  %s2024_s29 = sadd.s32 4294967294, %s2569_s27   ;;  %s2569_s27 = sphi %s2620_s27, %s3768_s27   ;;  %s2565_s26 = sphi %s2618_s26, %s3767_s26   ;;  %s2561_s25 = sphi %s2616_s25, %s3766_s25   ;;  %s2557_s24 = sphi %s2614_s24, %s3765_s24  }
   0x4   : > { %s2639_s30 = sadd.s32 1, %s2569_s27   ;;  %s179_s8 = sadd.s32 1, %s2565_s26 }
   0x5   : > { %s176_s9 = ssub.s32 %s2569_s27, %s2639_s30  ;;  %p189_p0 = scmp.ne.s32.totalorder %s2565_s26, %s2561_s25 }
   0x6   : > { %p177_p1 = scmp.eq.s32.totalorder %s176_s9, 0  ;;  %p190_p2 = scmp.eq.s32.totalorder %s2635_s28, 1 }
   0x7   : > { %p195_p3 = scmp.ne.s32.totalorder %s2561_s25, %s2557_s24  ;;  %p196_p4 = scmp.eq.s32.totalorder %s2024_s29, 1 }
   0x8   : > { %s2650_s10 = scalar_select %p177_p1, %s2565_s26, %s179_s8  }
   0x9   : > { %p2652_p5 = por %p190_p2, %p189_p0  ;;  %p2656_p6 = por %p196_p4, %p195_p3 }
   0xa   : > { %p2027_p7 = scmp.ge.s32.totalorder %s2569_s27, 1  ;;  %p240_p8 = scmp.lt.s32.totalorder %s2569_s27, 3 }
   0xc   : > { %p241_p9 = pnand %p2027_p7, %p240_p8 }
   0xe   : > { %244 = sbr.rel (%p241_p9) target bundleno = 1972 (0x7b4), region = 48 }
  0x15   : > { %p272_p10 = scmp.lt.s32.totalorder %s2635_s28, 1  ;;  %v3700_v0 = vmov 0.0   ;;  %v295_v3 = vld [vmem:[%s3693_s1] sm:$0xff]  ;;  %vm343_vm0 = vcmask 64512   ;;  %v296_v4 = vld [vmem:[%s3693_s1 + $0x8] sm:$0xff]  ;;  %v297_v5 = vld [vmem:[%s3693_s1 + $0x10] sm:$0xff] }
  0x16   : > { %552 = vmatprep.mubr.f32.mxu0 %v3700_v0  ;;  %1043 = vmatprep.mubr.f32.mxu1 %v3700_v0  ;;  %v298_v6 = vld [vmem:[%s3693_s1 + $0x18] sm:$0xff]  ;;  %v299_v7 = vld [vmem:[%s3693_s1 + $0x20] sm:$0xff]  ;;  %v300_v8 = vld [vmem:[%s3693_s1 + $0x28] sm:$0xff]  ;;  %s269_s22 = sand.u32 1, %s2561_s25   ;;  %s2085_s8 = sshll.u32 %s2635_s28, 8 }
  0x17   : > { %s273_s13 = scalar_select %p272_p10, %s2635_s28, 1  ;;  %v301_v9 = vld [vmem:[%s3693_s1 + $0x30] sm:$0xff]  ;;  %v302_v10 = vld [vmem:[%s3693_s1 + $0x38] sm:$0xff]  ;;  %v303_v11 = vld [vmem:[%s3693_s1 + $0x40] sm:$0xff] }
  0x18   : > { %v304_v12 = vld [vmem:[%s3693_s1 + $0x48] sm:$0xff]  ;;  %v305_v13 = vld [vmem:[%s3693_s1 + $0x50] sm:$0xff]  ;;  %v306_v14 = vld [vmem:[%s3693_s1 + $0x58] sm:$0xff]  ;;  %s2028_s23 = sshll.u32 %s269_s22, 4  ;;  %s3650_s16 = scalar_lea.hbm %s3699_s7, %s2085_s8 }
  0x19   : > { %s2084_s14 = sshll.u32 %s273_s13, 4  ;;  %v307_v15 = vld [vmem:[%s3693_s1 + $0x60] sm:$0xff]  ;;  %v308_v16 = vld [vmem:[%s3693_s1 + $0x68] sm:$0xff]  ;;  %v309_v17 = vld [vmem:[%s3693_s1 + $0x70] sm:$0xff]  ;;  %s1951_s28 = scalar_lea.sflag [#allocation3], %s269_s22 }
  0x1a   : > { %s2669_s17 = scalar_lea.vmem %s3692_s0, %s2084_s14  ;;  %v310_v18 = vld [vmem:[%s3693_s1 + $0x78] sm:$0xff]  ;;  %v311_v19 = vld [vmem:[%s3693_s1 + $0x80] sm:$0xff]  ;;  %v312_v20 = vld [vmem:[%s3693_s1 + $0x88] sm:$0xff] }
  0x1b   : > { %v278_v1 = vld [vmem:[%s2669_s17 + $0x8] sm:$0xff]  ;;  %v277_v2 = vld [vmem:[%s2669_s17] sm:$0xff]  ;;  %v313_v21 = vld [vmem:[%s3693_s1 + $0x90] sm:$0xff] }
  0x1c   : > { %488 = vmatprep.subr.mxu0 %v278_v1  ;;  %v314_v22 = vld [vmem:[%s3693_s1 + $0x98] sm:$0xff]  ;;  %v315_v23 = vld [vmem:[%s3693_s1 + $0xa0] sm:$0xff]  ;;  %v316_v24 = vld [vmem:[%s3693_s1 + $0xa8] sm:$0xff] }
  0x1d   : > { %489 = vmatpush1.msra.mxu0 %v277_v2  ;;  %v317_v25 = vld [vmem:[%s3693_s1 + $0xb0] sm:$0xff]  ;;  %v318_v26 = vld [vmem:[%s3693_s1 + $0xb8] sm:$0xff]  ;;  %v319_v27 = vld [vmem:[%s3693_s1 + $0xc0] sm:$0xff] }
  0x1e   : > { %2031 = vmatmul.mubr.msk.f32.vlgmr.msra.gmra.mrb[0].mxu0 %vm343_vm0, %v295_v3  ;;  %v320_v28 = vld [vmem:[%s3693_s1 + $0xc8] sm:$0xff]  ;;  %v321_v29 = vld [vmem:[%s3693_s1 + $0xd0] sm:$0xff]  ;;  %v322_v30 = vld [vmem:[%s3693_s1 + $0xd8] sm:$0xff] }
  0x1f   : > { %558 = vmatprep.mubr.f32.mxu0 %v3700_v0  ;;  %v323_v31 = vld [vmem:[%s3693_s1 + $0xe0] sm:$0xff]  ;;  %v324_v32 = vld [vmem:[%s3693_s1 + $0xe8] sm:$0xff]  ;;  %v325_v33 = vld [vmem:[%s3693_s1 + $0xf0] sm:$0xff] }
  0x20   : > { %v326_v34 = vld [vmem:[%s3693_s1 + $0xf8] sm:$0xff]  ;;  %v327_v35 = vld [vmem:[%s3693_s1 + $0x100] sm:$0xff]  ;;  %v328_v36 = vld [vmem:[%s3693_s1 + $0x108] sm:$0xff] }
  0x21   : > { %v329_v37 = vld [vmem:[%s3693_s1 + $0x110] sm:$0xff]  ;;  %v330_v38 = vld [vmem:[%s3693_s1 + $0x118] sm:$0xff]  ;;  %v331_v39 = vld [vmem:[%s3693_s1 + $0x120] sm:$0xff] }
  0x22   : > { %2032 = vmatmul.mubr.msk.f32.gmra.mrb[2].mxu0 %vm343_vm0, %v296_v4  ;;  %v332_v40 = vld [vmem:[%s3693_s1 + $0x128] sm:$0xff]  ;;  %v333_v41 = vld [vmem:[%s3693_s1 + $0x130] sm:$0xff]  ;;  %v334_v42 = vld [vmem:[%s3693_s1 + $0x138] sm:$0xff] }
  0x23   : > { %564 = vmatprep.mubr.f32.mxu0 %v3700_v0  ;;  %v335_v43 = vld [vmem:[%s3693_s1 + $0x140] sm:$0xff]  ;;  %v336_v44 = vld [vmem:[%s3693_s1 + $0x148] sm:$0xff]  ;;  %v337_v45 = vld [vmem:[%s3693_s1 + $0x150] sm:$0xff] }
  0x24   : > { %v338_v46 = vld [vmem:[%s3693_s1 + $0x158] sm:$0xff]  ;;  %v339_v49 = vld [vmem:[%s3693_s1 + $0x160] sm:$0xff]  ;;  %v340_v52 = vld [vmem:[%s3693_s1 + $0x168] sm:$0xff] }
  0x25   : > { %v341_v57 = vld [vmem:[%s3693_s1 + $0x170] sm:$0xff]  ;;  %v342_v62 = vld [vmem:[%s3693_s1 + $0x178] sm:$0xff] }
  0x26   : > { %2033 = vmatmul.mubr.msk.f32.gmra.mrb[4].mxu0 %vm343_vm0, %v297_v5 }
  0x27   : > { %570 = vmatprep.mubr.f32.mxu0 %v3700_v0 }
  0x2a   : > { %2034 = vmatmul.mubr.msk.f32.gmra.mrb[6].mxu0 %vm343_vm0, %v298_v6 }
  0x2b   : > { %576 = vmatprep.mubr.f32.mxu0 %v3700_v0 }
  0x2e   : > { %2035 = vmatmul.mubr.msk.f32.gmra.mrb[8].mxu0 %vm343_vm0, %v299_v7 }
  0x2f   : > { %582 = vmatprep.mubr.f32.mxu0 %v3700_v0 }
  0x32   : > { %2036 = vmatmul.mubr.msk.f32.gmra.mrb[10].mxu0 %vm343_vm0, %v300_v8 }
  0x33   : > { %588 = vmatprep.mubr.f32.mxu0 %v3700_v0 }
  0x36   : > { %2037 = vmatmul.mubr.msk.f32.gmra.mrb[12].mxu0 %vm343_vm0, %v301_v9 }
  0x37   : > { %594 = vmatprep.mubr.f32.mxu0 %v3700_v0 }
  0x3a   : > { %2038 = vmatmul.mubr.msk.f32.gmra.mrb[14].mxu0 %vm343_vm0, %v302_v10 }
  0x3b   : > { %600 = vmatprep.mubr.f32.mxu0 %v3700_v0 }
  0x3e   : > { %2039 = vmatmul.mubr.msk.f32.gmra.mrb[16].mxu0 %vm343_vm0, %v303_v11 }
  0x3f   : > { %606 = vmatprep.mubr.f32.mxu0 %v3700_v0 }
  0x42   : > { %2040 = vmatmul.mubr.msk.f32.gmra.mrb[18].mxu0 %vm343_vm0, %v304_v12 }
  0x43   : > { %612 = vmatprep.mubr.f32.mxu0 %v3700_v0 }
  0x46   : > { %2041 = vmatmul.mubr.msk.f32.gmra.mrb[20].mxu0 %vm343_vm0, %v305_v13 }
  0x47   : > { %618 = vmatprep.mubr.f32.mxu0 %v3700_v0 }
  0x4a   : > { %2042 = vmatmul.mubr.msk.f32.gmra.mrb[22].mxu0 %vm343_vm0, %v306_v14 }
  0x4b   : > { %624 = vmatprep.mubr.f32.mxu0 %v3700_v0 }
  0x4e   : > { %2043 = vmatmul.mubr.msk.f32.gmra.mrb[24].mxu0 %vm343_vm0, %v307_v15 }
  0x4f   : > { %630 = vmatprep.mubr.f32.mxu0 %v3700_v0 }
  0x52   : > { %2044 = vmatmul.mubr.msk.f32.gmra.mrb[26].mxu0 %vm343_vm0, %v308_v16 }
  0x53   : > { %636 = vmatprep.mubr.f32.mxu0 %v3700_v0 }
  0x56   : > { %2045 = vmatmul.mubr.msk.f32.gmra.mrb[28].mxu0 %vm343_vm0, %v309_v17 }
  0x57   : > { %642 = vmatprep.mubr.f32.mxu0 %v3700_v0 }
  0x5a   : > { %2046 = vmatmul.mubr.msk.f32.gmra.mrb[30].mxu0 %vm343_vm0, %v310_v18 }
  0x5b   : > { %648 = vmatprep.mubr.f32.mxu0 %v3700_v0 }
  0x5e   : > { %2047 = vmatmul.mubr.msk.f32.gmra.mrb[32].mxu0 %vm343_vm0, %v311_v19 }
  0x5f   : > { %654 = vmatprep.mubr.f32.mxu0 %v3700_v0 }
  0x62   : > { %2048 = vmatmul.mubr.msk.f32.gmra.mrb[34].mxu0 %vm343_vm0, %v312_v20 }
  0x63   : > { %660 = vmatprep.mubr.f32.mxu0 %v3700_v0 }
  0x66   : > { %2049 = vmatmul.mubr.msk.f32.gmra.mrb[36].mxu0 %vm343_vm0, %v313_v21 }
  0x67   : > { %666 = vmatprep.mubr.f32.mxu0 %v3700_v0 }
  0x6a   : > { %2050 = vmatmul.mubr.msk.f32.gmra.mrb[38].mxu0 %vm343_vm0, %v314_v22 }
  0x6b   : > { %672 = vmatprep.mubr.f32.mxu0 %v3700_v0 }
  0x6e   : > { %2051 = vmatmul.mubr.msk.f32.gmra.mrb[40].mxu0 %vm343_vm0, %v315_v23 }
  0x6f   : > { %678 = vmatprep.mubr.f32.mxu0 %v3700_v0 }
  0x72   : > { %2052 = vmatmul.mubr.msk.f32.gmra.mrb[42].mxu0 %vm343_vm0, %v316_v24 }
  0x73   : > { %684 = vmatprep.mubr.f32.mxu0 %v3700_v0 }
  0x76   : > { %2053 = vmatmul.mubr.msk.f32.gmra.mrb[44].mxu0 %vm343_vm0, %v317_v25 }
  0x77   : > { %690 = vmatprep.mubr.f32.mxu0 %v3700_v0 }
  0x7a   : > { %2054 = vmatmul.mubr.msk.f32.gmra.mrb[46].mxu0 %vm343_vm0, %v318_v26 }
  0x7b   : > { %696 = vmatprep.mubr.f32.mxu0 %v3700_v0 }
  0x7e   : > { %2055 = vmatmul.mubr.msk.f32.gmra.mrb[48].mxu0 %vm343_vm0, %v319_v27 }
  0x7f   : > { %702 = vmatprep.mubr.f32.mxu0 %v3700_v0 }
  0x82   : > { %2056 = vmatmul.mubr.msk.f32.gmra.mrb[50].mxu0 %vm343_vm0, %v320_v28 }
  0x83   : > { %708 = vmatprep.mubr.f32.mxu0 %v3700_v0 }
  0x86   : > { %2057 = vmatmul.mubr.msk.f32.gmra.mrb[52].mxu0 %vm343_vm0, %v321_v29 }
  0x87   : > { %714 = vmatprep.mubr.f32.mxu0 %v3700_v0 }
  0x8a   : > { %2058 = vmatmul.mubr.msk.f32.gmra.mrb[54].mxu0 %vm343_vm0, %v322_v30 }
  0x8b   : > { %720 = vmatprep.mubr.f32.mxu0 %v3700_v0 }
  0x8e   : > { %2059 = vmatmul.mubr.msk.f32.gmra.mrb[56].mxu0 %vm343_vm0, %v323_v31 }
  0x8f   : > { %726 = vmatprep.mubr.f32.mxu0 %v3700_v0 }
  0x92   : > { %2060 = vmatmul.mubr.msk.f32.gmra.mrb[58].mxu0 %vm343_vm0, %v324_v32 }
  0x93   : > { %732 = vmatprep.mubr.f32.mxu0 %v3700_v0 }
  0x96   : > { %2061 = vmatmul.mubr.msk.f32.gmra.mrb[60].mxu0 %vm343_vm0, %v325_v33 }
  0x97   : > { %738 = vmatprep.mubr.f32.mxu0 %v3700_v0 }
  0x9a   : > { %2062 = vmatmul.mubr.msk.f32.gmra.mrb[62].mxu0 %vm343_vm0, %v326_v34 }
  0x9b   : > { %744 = vmatprep.mubr.f32.mxu0 %v3700_v0 }
  0x9e   : > { %2063 = vmatmul.mubr.msk.f32.gmra.mrb[64].mxu0 %vm343_vm0, %v327_v35 }
  0x9f   : > { %750 = vmatprep.mubr.f32.mxu0 %v3700_v0 }
  0xa2   : > { %2064 = vmatmul.mubr.msk.f32.gmra.mrb[66].mxu0 %vm343_vm0, %v328_v36 }
  0xa3   : > { %756 = vmatprep.mubr.f32.mxu0 %v3700_v0 }
  0xa6   : > { %2065 = vmatmul.mubr.msk.f32.gmra.mrb[68].mxu0 %vm343_vm0, %v329_v37 }
  0xa7   : > { %762 = vmatprep.mubr.f32.mxu0 %v3700_v0 }
  0xaa   : > { %2066 = vmatmul.mubr.msk.f32.gmra.mrb[70].mxu0 %vm343_vm0, %v330_v38 }
  0xab   : > { %768 = vmatprep.mubr.f32.mxu0 %v3700_v0 }
  0xae   : > { %2067 = vmatmul.mubr.msk.f32.gmra.mrb[72].mxu0 %vm343_vm0, %v331_v39 }
  0xaf   : > { %774 = vmatprep.mubr.f32.mxu0 %v3700_v0 }
  0xb2   : > { %2068 = vmatmul.mubr.msk.f32.gmra.mrb[74].mxu0 %vm343_vm0, %v332_v40 }
  0xb3   : > { %780 = vmatprep.mubr.f32.mxu0 %v3700_v0 }
  0xb6   : > { %2069 = vmatmul.mubr.msk.f32.gmra.mrb[76].mxu0 %vm343_vm0, %v333_v41 }
  0xb7   : > { %786 = vmatprep.mubr.f32.mxu0 %v3700_v0 }
  0xba   : > { %2070 = vmatmul.mubr.msk.f32.gmra.mrb[78].mxu0 %vm343_vm0, %v334_v42 }
  0xbb   : > { %792 = vmatprep.mubr.f32.mxu0 %v3700_v0 }
  0xbe   : > { %2071 = vmatmul.mubr.msk.f32.gmra.mrb[80].mxu0 %vm343_vm0, %v335_v43 }
  0xbf   : > { %798 = vmatprep.mubr.f32.mxu0 %v3700_v0 }
  0xc2   : > { %2072 = vmatmul.mubr.msk.f32.gmra.mrb[82].mxu0 %vm343_vm0, %v336_v44 }
  0xc3   : > { %804 = vmatprep.mubr.f32.mxu0 %v3700_v0 }
  0xc6   : > { %2073 = vmatmul.mubr.msk.f32.gmra.mrb[84].mxu0 %vm343_vm0, %v337_v45 }
  0xc7   : > { %810 = vmatprep.mubr.f32.mxu0 %v3700_v0 }
  0xca   : > { %2074 = vmatmul.mubr.msk.f32.gmra.mrb[86].mxu0 %vm343_vm0, %v338_v46 }
  0xcb   : > { %816 = vmatprep.mubr.f32.mxu0 %v3700_v0 }
  0xce   : > { %2075 = vmatmul.mubr.msk.f32.gmra.mrb[88].mxu0 %vm343_vm0, %v339_v49 }
  0xcf   : > { %822 = vmatprep.mubr.f32.mxu0 %v3700_v0 }
  0xd2   : > { %2076 = vmatmul.mubr.msk.f32.gmra.mrb[90].mxu0 %vm343_vm0, %v340_v52 }
  0xd3   : > { %828 = vmatprep.mubr.f32.mxu0 %v3700_v0 }
  0xd6   : > { %2077 = vmatmul.mubr.msk.f32.gmra.mrb[92].mxu0 %vm343_vm0, %v341_v57 }
  0xd7   : > { %834 = vmatprep.mubr.f32.mxu0 %v3700_v0 }
  0xda   : > { %2078 = vmatmul.mubr.msk.f32.gmra.mrb[94].mxu0 %vm343_vm0, %v342_v62 }
  0xdb   : > { %1885 = vmatprep.mubr.f32.mxu0 %v3700_v0 }
  0xf1   : > { %v2891_v47 = vpop.f32.mrb[0].mxu0 }
  0xf2   : > { %v2893_v48 = vpop.f32.mrb[1].mxu0 }
  0xf5   : > { %v2900_v50 = vpop.f32.mrb[2].mxu0 }
  0xf6   : > { %v2902_v51 = vpop.f32.mrb[3].mxu0 }
  0xf9   : > { %v2909_v53 = vpop.f32.mrb[4].mxu0 }
  0xfa   : > { %v841_v54 = vmax.f32 %v2891_v47, %v2909_v53  ;;  %v2913_v55 = vpop.f32.mrb[5].mxu0 }
  0xfb   : > { %v862_v56 = vmax.f32 %v2893_v48, %v2913_v55 }
  0xfd   : > { %v2922_v58 = vpop.f32.mrb[6].mxu0 }
  0xfe   : > { %v842_v59 = vmax.f32 %v2900_v50, %v2922_v58  ;;  %v2926_v60 = vpop.f32.mrb[7].mxu0 }
  0xff   : > { %v863_v61 = vmax.f32 %v2902_v51, %v2926_v60 }
 0x101   : > { %v2935_v63 = vpop.f32.mrb[8].mxu0 }
 0x102   : > { %v843_v1 = vmax.f32 %v841_v54, %v2935_v63  ;;  %v2938_v2 = vpop.f32.mrb[9].mxu0 }
 0x103   : > { %v864_v3 = vmax.f32 %v862_v56, %v2938_v2 }
 0x105   : > { %v2943_v4 = vpop.f32.mrb[10].mxu0 }
 0x106   : > { %v844_v5 = vmax.f32 %v842_v59, %v2943_v4  ;;  %v2946_v6 = vpop.f32.mrb[11].mxu0 }
 0x107   : > { %v865_v7 = vmax.f32 %v863_v61, %v2946_v6 }
 0x109   : > { %v2949_v8 = vpop.f32.mrb[12].mxu0 }
 0x10a   : > { %v845_v9 = vmax.f32 %v843_v1, %v2949_v8  ;;  %v2952_v10 = vpop.f32.mrb[13].mxu0 }
 0x10b   : > { %v866_v11 = vmax.f32 %v864_v3, %v2952_v10 }
 0x10d   : > { %v2955_v12 = vpop.f32.mrb[14].mxu0 }
 0x10e   : > { %v846_v13 = vmax.f32 %v844_v5, %v2955_v12  ;;  %v2958_v14 = vpop.f32.mrb[15].mxu0 }
 0x10f   : > { %v867_v15 = vmax.f32 %v865_v7, %v2958_v14 }
 0x111   : > { %v2961_v16 = vpop.f32.mrb[16].mxu0 }
 0x112   : > { %v847_v17 = vmax.f32 %v845_v9, %v2961_v16  ;;  %v2964_v18 = vpop.f32.mrb[17].mxu0 }
 0x113   : > { %v868_v19 = vmax.f32 %v866_v11, %v2964_v18 }
 0x115   : > { %v2967_v20 = vpop.f32.mrb[18].mxu0 }
 0x116   : > { %v848_v21 = vmax.f32 %v846_v13, %v2967_v20  ;;  %v2970_v22 = vpop.f32.mrb[19].mxu0 }
 0x117   : > { %v869_v23 = vmax.f32 %v867_v15, %v2970_v22 }
 0x119   : > { %v2973_v24 = vpop.f32.mrb[20].mxu0 }
 0x11a   : > { %v849_v25 = vmax.f32 %v847_v17, %v2973_v24  ;;  %v2976_v26 = vpop.f32.mrb[21].mxu0 }
 0x11b   : > { %v870_v27 = vmax.f32 %v868_v19, %v2976_v26 }
 0x11d   : > { %v2979_v28 = vpop.f32.mrb[22].mxu0 }
 0x11e   : > { %v850_v29 = vmax.f32 %v848_v21, %v2979_v28  ;;  %v2982_v30 = vpop.f32.mrb[23].mxu0 }
 0x11f   : > { %v871_v31 = vmax.f32 %v869_v23, %v2982_v30 }
 0x121   : > { %v2985_v32 = vpop.f32.mrb[24].mxu0 }
 0x122   : > { %v851_v33 = vmax.f32 %v849_v25, %v2985_v32  ;;  %v2988_v34 = vpop.f32.mrb[25].mxu0 }
 0x123   : > { %v872_v35 = vmax.f32 %v870_v27, %v2988_v34 }
 0x125   : > { %v2991_v36 = vpop.f32.mrb[26].mxu0 }
 0x126   : > { %v852_v37 = vmax.f32 %v850_v29, %v2991_v36  ;;  %v2994_v38 = vpop.f32.mrb[27].mxu0 }
 0x127   : > { %v873_v39 = vmax.f32 %v871_v31, %v2994_v38 }
 0x129   : > { %v2997_v40 = vpop.f32.mrb[28].mxu0 }
 0x12a   : > { %v853_v41 = vmax.f32 %v851_v33, %v2997_v40  ;;  %v3000_v42 = vpop.f32.mrb[29].mxu0 }
 0x12b   : > { %v874_v43 = vmax.f32 %v872_v35, %v3000_v42 }
 0x12d   : > { %v644_v44 = vpop.f32.mrb[30].mxu0 }
 0x12e   : > { %v854_v45 = vmax.f32 %v852_v37, %v644_v44  ;;  %v646_v46 = vpop.f32.mrb[31].mxu0 }
 0x12f   : > { %v875_v49 = vmax.f32 %v873_v39, %v646_v46 }
 0x130   : > { %v855_v52 = vmax.f32 %v853_v41, %v854_v45 }
 0x131   : > { %v876_v54 = vmax.f32 %v874_v43, %v875_v49  ;;  %v3003_v56 = vpop.f32.mrb[32].mxu0 }
 0x132   : > { %v856_v57 = vrot.slane %v855_v52, 4  ;;  %v3005_v59 = vpop.f32.mrb[33].mxu0 }
 0x133   : > { %v877_v61 = vrot.slane %v876_v54, 4  ;;  %v1204_v62 = vmax.f32 %v3003_v56, %v3005_v59 }
 0x134   : > { %v857_v1 = vmax.f32 %v855_v52, %v856_v57 }
 0x135   : > { %v878_v3 = vmax.f32 %v876_v54, %v877_v61  ;;  %1205 = vmax.xlane.f32.xlu0 %v1204_v62  ;;  %v3009_v5 = vpop.f32.mrb[34].mxu0 }
 0x136   : > { %v858_v7 = vrot.slane %v857_v1, 2  ;;  %v3011_v9 = vpop.f32.mrb[35].mxu0 }
 0x137   : > { %v879_v11 = vrot.slane %v878_v3, 2  ;;  %v1207_v13 = vmax.f32 %v3009_v5, %v3011_v9 }
 0x138   : > { %v859_v15 = vmax.f32 %v857_v1, %v858_v7 }
 0x139   : > { %v880_v17 = vmax.f32 %v878_v3, %v879_v11  ;;  %1208 = vmax.xlane.f32.xlu0 %v1207_v13  ;;  %v3015_v19 = vpop.f32.mrb[36].mxu0 }
 0x13a   : > { %v860_v21 = vrot.slane %v859_v15, 1  ;;  %v3017_v23 = vpop.f32.mrb[37].mxu0 }
 0x13b   : > { %v881_v25 = vrot.slane %v880_v17, 1  ;;  %v1210_v27 = vmax.f32 %v3015_v19, %v3017_v23 }
 0x13c   : > { %v3021_v29 = vmax.f32 %v859_v15, %v860_v21 }
 0x13d   : > { %v3023_v31 = vmax.f32 %v880_v17, %v881_v25  ;;  %1211 = vmax.xlane.f32.xlu1 %v1210_v27  ;;  %v3025_v33 = vpop.f32.mrb[38].mxu0 }
 0x13e   : > { %v913_v35 = vsub.f32 %v644_v44, %v3021_v29  ;;  %v3028_v37 = vpop.f32.mrb[39].mxu0  ;;  %v883_v39 = vsub.f32 %v2891_v47, %v3021_v29  ;;  %v885_v41 = vsub.f32 %v2900_v50, %v3021_v29  ;;  %v887_v43 = vsub.f32 %v2909_v53, %v3021_v29 }
 0x13f   : > { %v914_v45 = vsub.f32 %v646_v46, %v3023_v31  ;;  %v1213_v49 = vmax.f32 %v3025_v33, %v3028_v37  ;;  %v884_v52 = vsub.f32 %v2893_v48, %v3023_v31  ;;  %v886_v44 = vsub.f32 %v2902_v51, %v3023_v31 }
 0x140   : > { %v975_v54 = vmul.f32 1.442695, %v913_v35  ;;  %v888_v47 = vsub.f32 %v2913_v55, %v3023_v31  ;;  %v890_v46 = vsub.f32 %v2926_v60, %v3023_v31  ;;  %v889_v61 = vsub.f32 %v2922_v58, %v3021_v29 }
 0x141   : > { %v977_v57 = vmul.f32 1.442695, %v914_v45  ;;  %1214 = vmax.xlane.f32.xlu1 %v1213_v49  ;;  %v3045_v50 = vpop.f32.mrb[40].mxu0  ;;  %v917_v53 = vmul.f32 1.442695, %v884_v52  ;;  %v892_v1 = vsub.f32 %v2938_v2, %v3023_v31  ;;  %v894_v60 = vsub.f32 %v2946_v6, %v3023_v31 }
 0x142   : > { %2263 = vpow2.f32 %v975_v54  ;;  %v3051_v48 = vpop.f32.mrb[41].mxu0  ;;  %v921_v62 = vmul.f32 1.442695, %v886_v44  ;;  %v915_v51 = vmul.f32 1.442695, %v883_v39  ;;  %v891_v13 = vsub.f32 %v2935_v63, %v3021_v29 }
 0x143   : > { %2265 = vpow2.f32 %v977_v57  ;;  %v1216_v55 = vmax.f32 %v3045_v50, %v3051_v48  ;;  %v919_v3 = vmul.f32 1.442695, %v885_v41  ;;  %v925_v7 = vmul.f32 1.442695, %v888_v47 }
 0x144   : > { %2267 = vpow2.f32 %v917_v53  ;;  %v929_v11 = vmul.f32 1.442695, %v890_v46  ;;  %v893_v2 = vsub.f32 %v2943_v4, %v3021_v29  ;;  %v896_v15 = vsub.f32 %v2952_v10, %v3023_v31 }
 0x145   : > { %1217 = vmax.xlane.f32.xlu0 %v1216_v55  ;;  %v3059_v58 = vpop.f32.mrb[42].mxu0  ;;  %2269 = vpow2.f32 %v921_v62  ;;  %v923_v21 = vmul.f32 1.442695, %v887_v43  ;;  %v898_v6 = vsub.f32 %v2958_v14, %v3023_v31  ;;  %v895_v25 = vsub.f32 %v2949_v8, %v3021_v29 }
 0x146   : > { %v3067_v17 = vpop.f32.mrb[43].mxu0  ;;  %2271 = vpow2.f32 %v915_v51  ;;  %v927_v63 = vmul.f32 1.442695, %v889_v61  ;;  %v933_v4 = vmul.f32 1.442695, %v892_v1  ;;  %v897_v10 = vsub.f32 %v2955_v12, %v3021_v29 }
 0x147   : > { %v1219_v27 = vmax.f32 %v3059_v58, %v3067_v17  ;;  %2273 = vpow2.f32 %v919_v3  ;;  %v937_v39 = vmul.f32 1.442695, %v894_v60  ;;  %v900_v14 = vsub.f32 %v2964_v18, %v3023_v31 }
 0x148   : > { %2275 = vpow2.f32 %v925_v7  ;;  %v902_v8 = vsub.f32 %v2970_v22, %v3023_v31  ;;  %v931_v43 = vmul.f32 1.442695, %v891_v13  ;;  %v899_v45 = vsub.f32 %v2961_v16, %v3021_v29 }
 0x149   : > { %1220 = vmax.xlane.f32.xlu1 %v1219_v27  ;;  %v3077_v35 = vpop.f32.mrb[44].mxu0  ;;  %2277 = vpow2.f32 %v929_v11  ;;  %v901_v12 = vsub.f32 %v2967_v20, %v3021_v29  ;;  %v935_v52 = vmul.f32 1.442695, %v893_v2  ;;  %v941_v18 = vmul.f32 1.442695, %v896_v15 }
 0x14a   : > { %v3083_v41 = vpop.f32.mrb[45].mxu0  ;;  %2279 = vpow2.f32 %v923_v21  ;;  %v945_v22 = vmul.f32 1.442695, %v898_v6  ;;  %v904_v54 = vsub.f32 %v2976_v26, %v3023_v31  ;;  %v906_v20 = vsub.f32 %v2982_v30, %v3023_v31 }
 0x14b   : > { %v1222_v49 = vmax.f32 %v3077_v35, %v3083_v41  ;;  %2281 = vpow2.f32 %v927_v63  ;;  %v903_v57 = vsub.f32 %v2973_v24, %v3021_v29  ;;  %v905_v53 = vsub.f32 %v2979_v28, %v3021_v29 }
 0x14c   : > { %v3091_v44 = vpop.eup %2263  ;;  %2283 = vpow2.f32 %v933_v4  ;;  %v939_v26 = vmul.f32 1.442695, %v895_v25  ;;  %v908_v62 = vsub.f32 %v2988_v34, %v3023_v31  ;;  %v910_v51 = vsub.f32 %v2994_v38, %v3023_v31 }
 0x14d   : > { %3724 = vst [vmem:[#allocation5_spill] sm:$0xff] %v3091_v44  ;;  %v3095_v47 = vpop.eup %2265  ;;  %1223 = vmax.xlane.f32.xlu0 %v1222_v49  ;;  %v3097_v16 = vpop.f32.mrb[46].mxu0  ;;  %2285 = vpow2.f32 %v937_v39  ;;  %v943_v30 = vmul.f32 1.442695, %v897_v10  ;;  %v949_v3 = vmul.f32 1.442695, %v900_v14  ;;  %v907_v60 = vsub.f32 %v2985_v32, %v3021_v29 }
 0x14e   : > { %3725 = vst [vmem:[#allocation6_spill] sm:$0xff] %v3095_v47  ;;  %v3105_v46 = vpop.eup %2267  ;;  %v3107_v61 = vpop.f32.mrb[47].mxu0  ;;  %2287 = vpow2.f32 %v931_v43  ;;  %v953_v7 = vmul.f32 1.442695, %v902_v8  ;;  %v947_v38 = vmul.f32 1.442695, %v899_v45  ;;  %v909_v13 = vsub.f32 %v2991_v36, %v3021_v29 }
 0x14f   : > { %v3113_v1 = vpop.eup %2269  ;;  %v1225_v24 = vmax.f32 %v3097_v16, %v3107_v61  ;;  %2289 = vpow2.f32 %v935_v52  ;;  %v912_v6 = vsub.f32 %v3000_v42, %v3023_v31  ;;  %v911_v25 = vsub.f32 %v2997_v40, %v3021_v29 }
 0x150   : > { %v3117_v28 = vpop.eup %2271  ;;  %v2086_v55 = vpack.c.bf16 %v3113_v1, %v3105_v46  ;;  %2291 = vpow2.f32 %v941_v18  ;;  %v951_v36 = vmul.f32 1.442695, %v901_v12  ;;  %v957_v10 = vmul.f32 1.442695, %v904_v54 }
 0x151   : > { %v3121_v11 = vpop.eup %2273  ;;  %1226 = vmax.xlane.f32.xlu1 %v1225_v24  ;;  %v3123_v34 = vpop.f32.mrb[48].mxu0  ;;  %2293 = vpow2.f32 %v945_v22  ;;  %v961_v40 = vmul.f32 1.442695, %v906_v20  ;;  %v955_v8 = vmul.f32 1.442695, %v903_v57 }
 0x152   : > { %v3129_v2 = vpop.eup %2275  ;;  %2087 = vmatprep.subr.bf16.mxu1 %v2086_v55  ;;  %v2088_v15 = vpack.c.bf16 %v3121_v11, %v3117_v28  ;;  %v3133_v21 = vpop.f32.mrb[49].mxu0  ;;  %2295 = vpow2.f32 %v939_v26  ;;  %v959_v12 = vmul.f32 1.442695, %v905_v53  ;;  %v965_v18 = vmul.f32 1.442695, %v908_v62 }
 0x153   : > { %v3139_v27 = vpop.eup %2277  ;;  %v1228_v32 = vmax.f32 %v3123_v34, %v3133_v21  ;;  %2297 = vpow2.f32 %v943_v30  ;;  %v969_v20 = vmul.f32 1.442695, %v910_v51  ;;  %v963_v24 = vmul.f32 1.442695, %v907_v60 }
 0x154   : > { %v3143_v63 = vpop.eup %2279  ;;  %2089 = vmatpush1.bf16.msra.mxu1 %v2088_v15  ;;  %v2090_v4 = vpack.c.bf16 %v3139_v27, %v3129_v2  ;;  %2299 = vpow2.f32 %v949_v3  ;;  %v967_v55 = vmul.f32 1.442695, %v909_v13  ;;  %v971_v60 = vmul.f32 1.442695, %v911_v25 }
 0x155   : > { %v3147_v39 = vpop.eup %2281  ;;  %1229 = vmax.xlane.f32.xlu0 %v1228_v32  ;;  %v3149_v42 = vpop.f32.mrb[50].mxu0  ;;  %2301 = vpow2.f32 %v953_v7  ;;  %v973_v7 = vmul.f32 1.442695, %v912_v6 }
 0x156   : > { %v3151_v29 = vpop.eup %2283  ;;  %2091 = vmatprep.subr.bf16.mxu1 %v2090_v4  ;;  %v2092_v31 = vpack.c.bf16 %v3147_v39, %v3143_v63  ;;  %v3155_v14 = vpop.f32.mrb[51].mxu0  ;;  %2303 = vpow2.f32 %v947_v38 }
 0x157   : > { %v3157_v43 = vpop.eup %2285  ;;  %v1231_v45 = vmax.f32 %v3149_v42, %v3155_v14  ;;  %2305 = vpow2.f32 %v951_v36 }
 0x158   : > { %v3161_v49 = vpop.eup %2287  ;;  %2093 = vmatpush1.bf16.msra.mxu1 %v2092_v31  ;;  %v2094_v52 = vpack.c.bf16 %v3157_v43, %v3151_v29  ;;  %2307 = vpow2.f32 %v957_v10 }
 0x159   : > { %v3165_v22 = vpop.eup %2289  ;;  %1232 = vmax.xlane.f32.xlu1 %v1231_v45  ;;  %v3167_v54 = vpop.f32.mrb[52].mxu0  ;;  %2309 = vpow2.f32 %v961_v40 }
 0x15a   : > { %v3169_v57 = vpop.eup %2291  ;;  %2095 = vmatprep.subr.bf16.mxu1 %v2094_v52  ;;  %v2096_v53 = vpack.c.bf16 %v3165_v22, %v3161_v49  ;;  %v3173_v26 = vpop.f32.mrb[53].mxu0  ;;  %2311 = vpow2.f32 %v955_v8 }
 0x15b   : > { %3726 = vst [vmem:[#allocation7_spill] sm:$0xff] %v3169_v57  ;;  %v3175_v30 = vpop.eup %2293  ;;  %v1234_v62 = vmax.f32 %v3167_v54, %v3173_v26  ;;  %2313 = vpow2.f32 %v959_v12 }
 0x15c   : > { %3727 = vst [vmem:[#allocation8_spill] sm:$0xff] %v3175_v30  ;;  %v3179_v3 = vpop.eup %2295  ;;  %2097 = vmatpush1.bf16.msra.mxu1 %v2096_v53  ;;  %v2098_v51 = vpack.c.bf16 %v3175_v30, %v3169_v57  ;;  %2315 = vpow2.f32 %v965_v18 }
 0x15d   : > { %v3183_v38 = vpop.eup %2297  ;;  %1235 = vmax.xlane.f32.xlu0 %v1234_v62  ;;  %v3185_v15 = vpop.f32.mrb[54].mxu0  ;;  %2317 = vpow2.f32 %v969_v20 }
 0x15e   : > { %3728 = vst [vmem:[#allocation9_spill] sm:$0xff] %v3183_v38  ;;  %v3187_v32 = vpop.eup %2299  ;;  %2099 = vmatprep.subr.bf16.mxu1 %v2098_v51  ;;  %v2100_v13 = vpack.c.bf16 %v3183_v38, %v3179_v3  ;;  %v3191_v36 = vpop.f32.mrb[55].mxu0  ;;  %2319 = vpow2.f32 %v963_v24 }
 0x15f   : > { %3729 = vst [vmem:[#allocation10_spill] sm:$0xff] %v3187_v32  ;;  %v3193_v4 = vpop.eup %2301  ;;  %v1237_v6 = vmax.f32 %v3185_v15, %v3191_v36  ;;  %2321 = vpow2.f32 %v967_v55 }
 0x160   : > { %3730 = vst [vmem:[#allocation11_spill] sm:$0xff] %v3193_v4  ;;  %v3197_v10 = vpop.eup %2303  ;;  %2101 = vmatpush1.bf16.msra.mxu1 %v2100_v13  ;;  %v2102_v25 = vpack.c.bf16 %v3193_v4, %v3187_v32  ;;  %2323 = vpow2.f32 %v973_v7 }
 0x161   : > { %3731 = vst [vmem:[#allocation12_spill] sm:$0xff] %v3197_v10  ;;  %v3201_v40 = vpop.eup %2305  ;;  %1238 = vmax.xlane.f32.xlu1 %v1237_v6  ;;  %v3203_v31 = vpop.f32.mrb[56].mxu0  ;;  %2325 = vpow2.f32 %v971_v60 }
 0x162   : > { %3732 = vst [vmem:[#allocation13_spill] sm:$0xff] %v3201_v40  ;;  %v3205_v8 = vpop.eup %2307  ;;  %2103 = vmatprep.subr.bf16.mxu1 %v2102_v25  ;;  %v2104_v45 = vpack.c.bf16 %v3201_v40, %v3197_v10  ;;  %v3209_v12 = vpop.f32.mrb[57].mxu0 }
 0x163   : > { %3733 = vst [vmem:[#allocation14_spill] sm:$0xff] %v3205_v8  ;;  %v3211_v52 = vpop.eup %2309  ;;  %v1240_v18 = vmax.f32 %v3203_v31, %v3209_v12 }
 0x164   : > { %3734 = vst [vmem:[#allocation15_spill] sm:$0xff] %v3211_v52  ;;  %v3215_v20 = vpop.eup %2311  ;;  %2105 = vmatpush1.bf16.msra.mxu1 %v2104_v45  ;;  %v2106_v53 = vpack.c.bf16 %v3211_v52, %v3205_v8 }
 0x165   : > { %3735 = vst [vmem:[#allocation16_spill] sm:$0xff] %v3215_v20  ;;  %v3219_v24 = vpop.eup %2313  ;;  %1241 = vmax.xlane.f32.xlu0 %v1240_v18  ;;  %v3221_v62 = vpop.f32.mrb[58].mxu0 }
 0x166   : > { %3736 = vst [vmem:[#allocation17_spill] sm:$0xff] %v3219_v24  ;;  %v3223_v55 = vpop.eup %2315  ;;  %2107 = vmatprep.subr.bf16.mxu1 %v2106_v53  ;;  %v2108_v51 = vpack.c.bf16 %v3219_v24, %v3215_v20  ;;  %v3227_v7 = vpop.f32.mrb[59].mxu0  ;;  %v291_v20 = vld [vmem:[%s3698_s6 + $0x60] sm:$0xff] }
 0x167   : > { %3737 = vst [vmem:[#allocation18_spill] sm:$0xff] %v3223_v55  ;;  %v3229_v60 = vpop.eup %2317  ;;  %v1243_v13 = vmax.f32 %v3221_v62, %v3227_v7 }
 0x168   : > { %3738 = vst [vmem:[#allocation19_spill] sm:$0xff] %v3229_v60  ;;  %v3233_v6 = vpop.eup %2319  ;;  %2109 = vmatpush1.bf16.msra.mxu1 %v2108_v51  ;;  %v2110_v25 = vpack.c.bf16 %v3229_v60, %v3223_v55 }
 0x169   : > { %3739 = vst [vmem:[#allocation20_spill] sm:$0xff] %v3233_v6  ;;  %v3237_v45 = vpop.eup %2321  ;;  %1244 = vmax.xlane.f32.xlu1 %v1243_v13  ;;  %v3239_v18 = vpop.f32.mrb[60].mxu0 }
 0x16a   : > { %3740 = vst [vmem:[#allocation21_spill] sm:$0xff] %v3237_v45  ;;  %v3241_v53 = vpop.eup %2323  ;;  %2111 = vmatprep.subr.bf16.mxu1 %v2110_v25  ;;  %v2112_v0 = vpack.c.bf16 %v3237_v45, %v3233_v6  ;;  %v3245_v52 = vpop.f32.mrb[61].mxu0 }
 0x16b   : > { %3741 = vst [vmem:[#allocation22_spill] sm:$0xff] %v3241_v53  ;;  %v3247_v8 = vpop.eup %2325  ;;  %v2114_v51 = vpack.c.bf16 %v3095_v47, %v3241_v53  ;;  %v1246_v60 = vmax.f32 %v3239_v18, %v3245_v52  ;;  %v279_v47 = vld [vmem:[%s3698_s6] sm:$0xff] }
 0x16c   : > { %3742 = vst [vmem:[#allocation23_spill] sm:$0xff] %v3247_v8  ;;  %2113 = vmatpush1.bf16.msra.mxu1 %v2112_v0  ;;  %v2116_v25 = vpack.c.bf16 %v3091_v44, %v3247_v8  ;;  %v3743_v0 = vmov 0.0  }
 0x16d   : > { %2115 = vmatprep.subr.bf16.mxu1 %v2114_v51  ;;  %1247 = vmax.xlane.f32.xlu0 %v1246_v60  ;;  %v3253_v13 = vpop.f32.mrb[62].mxu0  ;;  %v280_v60 = vld [vmem:[%s3698_s6 + $0x8] sm:$0xff]  ;;  %v281_v51 = vld [vmem:[%s3698_s6 + $0x10] sm:$0xff] }
 0x16e   : > { %v3257_v55 = vpop.f32.mrb[63].mxu0 }
 0x16f   : > { %v1249_v45 = vmax.f32 %v3253_v13, %v3257_v55 }
 0x170   : > { %2117 = vmatpush1.bf16.msra.mxu1 %v2116_v25  ;;  %v284_v25 = vld [vmem:[%s3698_s6 + $0x28] sm:$0xff] }
 0x171   : > { %1250 = vmax.xlane.f32.xlu1 %v1249_v45  ;;  %v283_v45 = vld [vmem:[%s3698_s6 + $0x20] sm:$0xff] }
 0x173   : > { %1044 = vmatmul.mubr.f32.vlgmr.msra.gmra.mrb[0].mxu1 %v279_v47  ;;  %v282_v47 = vld [vmem:[%s3698_s6 + $0x18] sm:$0xff] }
 0x174   : > { %1049 = vmatprep.mubr.f32.mxu1 %v3743_v0 }
 0x177   : > { %1050 = vmatmul.mubr.f32.gmra.mrb[2].mxu1 %v280_v60  ;;  %v285_v60 = vld [vmem:[%s3698_s6 + $0x30] sm:$0xff] }
 0x178   : > { %1055 = vmatprep.mubr.f32.mxu1 %v3743_v0 }
 0x17b   : > { %1056 = vmatmul.mubr.f32.gmra.mrb[4].mxu1 %v281_v51  ;;  %v286_v51 = vld [vmem:[%s3698_s6 + $0x38] sm:$0xff] }
 0x17c   : > { %1061 = vmatprep.mubr.f32.mxu1 %v3743_v0 }
 0x17f   : > { %1062 = vmatmul.mubr.f32.gmra.mrb[6].mxu1 %v282_v47  ;;  %v287_v47 = vld [vmem:[%s3698_s6 + $0x40] sm:$0xff] }
 0x180   : > { %1067 = vmatprep.mubr.f32.mxu1 %v3743_v0 }
 0x183   : > { %1068 = vmatmul.mubr.f32.gmra.mrb[8].mxu1 %v283_v45  ;;  %v288_v45 = vld [vmem:[%s3698_s6 + $0x48] sm:$0xff] }
 0x184   : > { %1073 = vmatprep.mubr.f32.mxu1 %v3743_v0 }
 0x187   : > { %1074 = vmatmul.mubr.f32.gmra.mrb[10].mxu1 %v284_v25  ;;  %v746_v25 = vpop.f32.mrb[64].mxu0 }
 0x188   : > { %1079 = vmatprep.mubr.f32.mxu1 %v3743_v0 }
 0x18b   : > { %1080 = vmatmul.mubr.f32.gmra.mrb[12].mxu1 %v285_v60  ;;  %v748_v60 = vpop.f32.mrb[65].mxu0 }
 0x18c   : > { %1085 = vmatprep.mubr.f32.mxu1 %v3743_v0  ;;  %v752_v53 = vpop.f32.mrb[66].mxu0 }
 0x18d   : > { %v2120_v44 = vpack.c.bf16 %v752_v53, %v746_v25  ;;  %v754_v8 = vpop.f32.mrb[67].mxu0 }
 0x18e   : > { %v2118_v6 = vpack.c.bf16 %v754_v8, %v748_v60  ;;  %v292_v8 = vld [vmem:[%s3698_s6 + $0x68] sm:$0xff]  ;;  %v293_v60 = vld [vmem:[%s3698_s6 + $0x70] sm:$0xff] }
 0x18f   : > { %1086 = vmatmul.mubr.f32.gmra.mrb[14].mxu1 %v286_v51  ;;  %v289_v51 = vld [vmem:[%s3698_s6 + $0x50] sm:$0xff] }
 0x190   : > { %1091 = vmatprep.mubr.f32.mxu1 %v3743_v0  ;;  %2119 = vmatprep.subr.bf16.mxu1 %v2118_v6 }
 0x191   : > { %2121 = vmatpush1.bf16.xpose.msra.mxu1 %v2120_v44 }
 0x193   : > { %1092 = vmatmul.mubr.f32.gmra.mrb[16].mxu1 %v287_v47  ;;  %v290_v47 = vld [vmem:[%s3698_s6 + $0x58] sm:$0xff] }
 0x194   : > { %1097 = vmatprep.mubr.f32.mxu1 %v3743_v0 }
 0x197   : > { %1098 = vmatmul.mubr.f32.gmra.mrb[18].mxu1 %v288_v45  ;;  %v758_v45 = vpop.f32.mrb[68].mxu0 }
 0x198   : > { %1103 = vmatprep.mubr.f32.mxu1 %v3743_v0  ;;  %v760_v24 = vpop.f32.mrb[69].mxu0 }
 0x199   : > { %v764_v53 = vpop.f32.mrb[70].mxu0 }
 0x19a   : > { %v2124_v25 = vpack.c.bf16 %v764_v53, %v758_v45 }
 0x19b   : > { %1104 = vmatmul.mubr.f32.gmra.mrb[20].mxu1 %v289_v51  ;;  %v766_v51 = vpop.f32.mrb[71].mxu0 }
 0x19c   : > { %1109 = vmatprep.mubr.f32.mxu1 %v3743_v0  ;;  %v2122_v6 = vpack.c.bf16 %v766_v51, %v760_v24  ;;  %v770_v44 = vpop.f32.mrb[72].mxu0 }
 0x19e   : > { %2123 = vmatprep.subr.bf16.mxu1 %v2122_v6 }
 0x19f   : > { %1110 = vmatmul.mubr.f32.gmra.mrb[22].mxu1 %v290_v47  ;;  %v294_v47 = vld [vmem:[%s3698_s6 + $0x78] sm:$0xff] }
 0x1a0   : > { %1115 = vmatprep.mubr.f32.mxu1 %v3743_v0  ;;  %2125 = vmatpush1.bf16.xpose.msra.mxu1 %v2124_v25 }
 0x1a3   : > { %1116 = vmatmul.mubr.f32.gmra.mrb[24].mxu1 %v291_v20  ;;  %v772_v20 = vpop.f32.mrb[73].mxu0 }
 0x1a4   : > { %1121 = vmatprep.mubr.f32.mxu1 %v3743_v0  ;;  %v776_v45 = vpop.f32.mrb[74].mxu0 }
 0x1a5   : > { %v2128_v24 = vpack.c.bf16 %v776_v45, %v770_v44  ;;  %v778_v53 = vpop.f32.mrb[75].mxu0 }
 0x1a6   : > { %v2126_v51 = vpack.c.bf16 %v778_v53, %v772_v20 }
 0x1a7   : > { %1122 = vmatmul.mubr.f32.gmra.mrb[26].mxu1 %v292_v8  ;;  %v782_v8 = vpop.f32.mrb[76].mxu0 }
 0x1a8   : > { %1127 = vmatprep.mubr.f32.mxu1 %v3743_v0  ;;  %2127 = vmatprep.subr.bf16.mxu1 %v2126_v51  ;;  %v784_v6 = vpop.f32.mrb[77].mxu0 }
 0x1a9   : > { %2129 = vmatpush1.bf16.xpose.msra.mxu1 %v2128_v24  ;;  %v788_v4 = vpop.f32.mrb[78].mxu0 }
 0x1aa   : > { %v2132_v25 = vpack.c.bf16 %v788_v4, %v782_v8  ;;  %v790_v32 = vpop.f32.mrb[79].mxu0 }
 0x1ab   : > { %1128 = vmatmul.mubr.f32.gmra.mrb[28].mxu1 %v293_v60  ;;  %v2130_v60 = vpack.c.bf16 %v790_v32, %v784_v6  ;;  %v794_v40 = vpop.f32.mrb[80].mxu0 }
 0x1ac   : > { %1133 = vmatprep.mubr.f32.mxu1 %v3743_v0  ;;  %v796_v0 = vpop.f32.mrb[81].mxu0 }
 0x1ad   : > { %2131 = vmatprep.subr.bf16.mxu1 %v2130_v60  ;;  %v800_v10 = vpop.f32.mrb[82].mxu0 }
 0x1ae   : > { %v2136_v30 = vpack.c.bf16 %v800_v10, %v794_v40  ;;  %v802_v57 = vpop.f32.mrb[83].mxu0 }
 0x1af   : > { %1134 = vmatmul.mubr.f32.gmra.mrb[30].mxu1 %v294_v47  ;;  %v2134_v38 = vpack.c.bf16 %v802_v57, %v796_v0  ;;  %v806_v44 = vpop.f32.mrb[84].mxu0 }
 0x1b0   : > { %v808_v24 = vpop.f32.mrb[85].mxu0 }
 0x1b1   : > { %2133 = vmatpush1.bf16.xpose.msra.mxu1 %v2132_v25  ;;  %v812_v51 = vpop.f32.mrb[86].mxu0 }
 0x1b2   : > { %2135 = vmatprep.subr.bf16.mxu1 %v2134_v38  ;;  %v2140_v40 = vpack.c.bf16 %v812_v51, %v806_v44  ;;  %v814_v57 = vpop.f32.mrb[87].mxu0 }
 0x1b3   : > { %v2138_v38 = vpack.c.bf16 %v814_v57, %v808_v24  ;;  %v818_v25 = vpop.f32.mrb[88].mxu0 }
 0x1b4   : > { %v820_v60 = vpop.f32.mrb[89].mxu0 }
 0x1b5   : > { %v824_v44 = vpop.f32.mrb[90].mxu0 }
 0x1b6   : > { %v2144_v24 = vpack.c.bf16 %v824_v44, %v818_v25 }
 0x1b9   : > { %2137 = vmatpush1.bf16.xpose.msra.mxu1 %v2136_v30 }
 0x1ba   : > { %2139 = vmatprep.subr.bf16.mxu1 %v2138_v38 }
 0x1c1   : > { %2141 = vmatpush1.bf16.xpose.msra.mxu1 %v2140_v40 }
 0x1c2   : > { %v1206_v47 = vpop.xlane.xlu0 %1205 }
 0x1c3   : > { %v1252_v20 = vsub.f32 %v3003_v56, %v1206_v47  ;;  %v1253_v45 = vsub.f32 %v3005_v59, %v1206_v47 }
 0x1c5   : > { %v1284_v4 = vmul.f32 1.442695, %v1252_v20  ;;  %v1286_v53 = vmul.f32 1.442695, %v1253_v45 }
 0x1c6   : > { %v1209_v32 = vpop.xlane.xlu0 %1208 }
 0x1c7   : > { %2327 = vpow2.f32 %v1284_v4  ;;  %v1254_v8 = vsub.f32 %v3009_v5, %v1209_v32  ;;  %v1255_v10 = vsub.f32 %v3011_v9, %v1209_v32  ;;  %v826_v4 = vpop.f32.mrb[91].mxu0 }
 0x1c8   : > { %2329 = vpow2.f32 %v1286_v53  ;;  %v2142_v53 = vpack.c.bf16 %v826_v4, %v820_v60 }
 0x1c9   : > { %v1288_v0 = vmul.f32 1.442695, %v1254_v8  ;;  %v1290_v6 = vmul.f32 1.442695, %v1255_v10 }
 0x1ca   : > { %v1212_v56 = vpop.xlane.xlu1 %1211  ;;  %2143 = vmatprep.subr.bf16.mxu1 %v2142_v53 }
 0x1cb   : > { %2331 = vpow2.f32 %v1288_v0  ;;  %v1256_v59 = vsub.f32 %v3015_v19, %v1212_v56  ;;  %v1257_v30 = vsub.f32 %v3017_v23, %v1212_v56  ;;  %2145 = vmatpush1.bf16.xpose.msra.mxu1 %v2144_v24 }
 0x1cc   : > { %2333 = vpow2.f32 %v1290_v6 }
 0x1cd   : > { %v1292_v5 = vmul.f32 1.442695, %v1256_v59  ;;  %v1294_v47 = vmul.f32 1.442695, %v1257_v30 }
 0x1ce   : > { %v1215_v9 = vpop.xlane.xlu1 %1214 }
 0x1cf   : > { %2335 = vpow2.f32 %v1292_v5  ;;  %v1258_v20 = vsub.f32 %v3025_v33, %v1215_v9  ;;  %v1259_v45 = vsub.f32 %v3028_v37, %v1215_v9  ;;  %v830_v37 = vpop.f32.mrb[92].mxu0 }
 0x1d0   : > { %2337 = vpow2.f32 %v1294_v47  ;;  %v832_v57 = vpop.f32.mrb[93].mxu0 }
 0x1d1   : > { %v3332_v19 = vpop.eup %2327  ;;  %v1296_v23 = vmul.f32 1.442695, %v1258_v20  ;;  %v1298_v32 = vmul.f32 1.442695, %v1259_v45  ;;  %v836_v30 = vpop.f32.mrb[94].mxu0 }
 0x1d2   : > { %v3334_v51 = vpop.eup %2329  ;;  %v1218_v8 = vpop.xlane.xlu0 %1217  ;;  %v2148_v5 = vpack.c.bf16 %v836_v30, %v830_v37 }
 0x1d3   : > { %2339 = vpow2.f32 %v1296_v23  ;;  %v1260_v10 = vsub.f32 %v3045_v50, %v1218_v8  ;;  %v1261_v40 = vsub.f32 %v3051_v48, %v1218_v8  ;;  %v1348_v33 = vadd.f32 %v3334_v51, %v3332_v19  ;;  %v838_v60 = vpop.f32.mrb[95].mxu0 }
 0x1d4   : > { %2341 = vpow2.f32 %v1298_v32  ;;  %v2146_v47 = vpack.c.bf16 %v838_v60, %v832_v57 }
 0x1d5   : > { %v3340_v38 = vpop.eup %2331  ;;  %v1300_v0 = vmul.f32 1.442695, %v1260_v10  ;;  %v1302_v6 = vmul.f32 1.442695, %v1261_v40  ;;  %1349 = vadd.xlane.f32.xlu0 %v1348_v33 }
 0x1d6   : > { %v3342_v56 = vpop.eup %2333  ;;  %v1221_v59 = vpop.xlane.xlu1 %1220  ;;  %2147 = vmatprep.subr.bf16.mxu1 %v2146_v47 }
 0x1d7   : > { %2343 = vpow2.f32 %v1300_v0  ;;  %v1262_v50 = vsub.f32 %v3059_v58, %v1221_v59  ;;  %v1263_v48 = vsub.f32 %v3067_v17, %v1221_v59  ;;  %v1351_v25 = vadd.f32 %v3342_v56, %v3340_v38  ;;  %2149 = vmatpush1.bf16.xpose.msra.mxu1 %v2148_v5 }
 0x1d8   : > { %2345 = vpow2.f32 %v1302_v6 }
 0x1d9   : > { %v3348_v9 = vpop.eup %2335  ;;  %v1304_v44 = vmul.f32 1.442695, %v1262_v50  ;;  %v1306_v20 = vmul.f32 1.442695, %v1263_v48  ;;  %1352 = vadd.xlane.f32.xlu1 %v1351_v25 }
 0x1da   : > { %v3350_v45 = vpop.eup %2337  ;;  %v1224_v24 = vpop.xlane.xlu0 %1223 }
 0x1db   : > { %2347 = vpow2.f32 %v1304_v44  ;;  %v1264_v58 = vsub.f32 %v3077_v35, %v1224_v24  ;;  %v1265_v17 = vsub.f32 %v3083_v41, %v1224_v24  ;;  %v1354_v4 = vadd.f32 %v3350_v45, %v3348_v9 }
 0x1dc   : > { %2349 = vpow2.f32 %v1306_v20 }
 0x1dd   : > { %v3356_v53 = vpop.eup %2339  ;;  %v1308_v23 = vmul.f32 1.442695, %v1264_v58  ;;  %v1310_v32 = vmul.f32 1.442695, %v1265_v17  ;;  %1355 = vadd.xlane.f32.xlu0 %v1354_v4 }
 0x1de   : > { %v3358_v8 = vpop.eup %2341  ;;  %v1227_v10 = vpop.xlane.xlu1 %1226 }
 0x1df   : > { %2351 = vpow2.f32 %v1308_v23  ;;  %v1266_v40 = vsub.f32 %v3097_v16, %v1227_v10  ;;  %v1267_v35 = vsub.f32 %v3107_v61, %v1227_v10  ;;  %v1357_v41 = vadd.f32 %v3358_v8, %v3356_v53 }
 0x1e0   : > { %2353 = vpow2.f32 %v1310_v32 }
 0x1e1   : > { %v3364_v33 = vpop.eup %2343  ;;  %v1312_v37 = vmul.f32 1.442695, %v1266_v40  ;;  %v1314_v57 = vmul.f32 1.442695, %v1267_v35  ;;  %1358 = vadd.xlane.f32.xlu1 %v1357_v41 }
 0x1e2   : > { %v3366_v0 = vpop.eup %2345  ;;  %v1230_v6 = vpop.xlane.xlu0 %1229 }
 0x1e3   : > { %2355 = vpow2.f32 %v1312_v37  ;;  %v1268_v59 = vsub.f32 %v3123_v34, %v1230_v6  ;;  %v1269_v30 = vsub.f32 %v3133_v21, %v1230_v6  ;;  %v1360_v16 = vadd.f32 %v3366_v0, %v3364_v33 }
 0x1e4   : > { %2357 = vpow2.f32 %v1314_v57 }
 0x1e5   : > { %v3372_v61 = vpop.eup %2347  ;;  %v1316_v50 = vmul.f32 1.442695, %v1268_v59  ;;  %v1318_v48 = vmul.f32 1.442695, %v1269_v30  ;;  %1361 = vadd.xlane.f32.xlu0 %v1360_v16 }
 0x1e6   : > { %v3374_v25 = vpop.eup %2349  ;;  %v1233_v60 = vpop.xlane.xlu1 %1232 }
 0x1e7   : > { %2359 = vpow2.f32 %v1316_v50  ;;  %v1270_v5 = vsub.f32 %v3149_v42, %v1233_v60  ;;  %v1271_v47 = vsub.f32 %v3155_v14, %v1233_v60  ;;  %v1363_v34 = vadd.f32 %v3374_v25, %v3372_v61 }
 0x1e8   : > { %2361 = vpow2.f32 %v1318_v48 }
 0x1e9   : > { %v3380_v21 = vpop.eup %2351  ;;  %v1320_v44 = vmul.f32 1.442695, %v1270_v5  ;;  %v1322_v20 = vmul.f32 1.442695, %v1271_v47  ;;  %1364 = vadd.xlane.f32.xlu1 %v1363_v34 }
 0x1ea   : > { %v3382_v24 = vpop.eup %2353  ;;  %v1236_v58 = vpop.xlane.xlu0 %1235 }
 0x1eb   : > { %2363 = vpow2.f32 %v1320_v44  ;;  %v1272_v17 = vsub.f32 %v3167_v54, %v1236_v58  ;;  %v1273_v4 = vsub.f32 %v3173_v26, %v1236_v58  ;;  %v1366_v42 = vadd.f32 %v3382_v24, %v3380_v21 }
 0x1ec   : > { %2365 = vpow2.f32 %v1322_v20 }
 0x1ed   : > { %v3388_v14 = vpop.eup %2355  ;;  %v1324_v23 = vmul.f32 1.442695, %v1272_v17  ;;  %v1326_v32 = vmul.f32 1.442695, %v1273_v4  ;;  %1367 = vadd.xlane.f32.xlu0 %v1366_v42 }
 0x1ee   : > { %v3390_v10 = vpop.eup %2357  ;;  %v1239_v40 = vpop.xlane.xlu1 %1238 }
 0x1ef   : > { %2367 = vpow2.f32 %v1324_v23  ;;  %v1274_v35 = vsub.f32 %v3185_v15, %v1239_v40  ;;  %v1275_v41 = vsub.f32 %v3191_v36, %v1239_v40  ;;  %v1369_v54 = vadd.f32 %v3390_v10, %v3388_v14 }
 0x1f0   : > { %2369 = vpow2.f32 %v1326_v32 }
 0x1f1   : > { %v3396_v26 = vpop.eup %2359  ;;  %v1328_v37 = vmul.f32 1.442695, %v1274_v35  ;;  %v1330_v57 = vmul.f32 1.442695, %v1275_v41  ;;  %1370 = vadd.xlane.f32.xlu1 %v1369_v54 }
 0x1f2   : > { %v3398_v6 = vpop.eup %2361  ;;  %v1242_v59 = vpop.xlane.xlu0 %1241 }
 0x1f3   : > { %2371 = vpow2.f32 %v1328_v37  ;;  %v1276_v30 = vsub.f32 %v3203_v31, %v1242_v59  ;;  %v1277_v16 = vsub.f32 %v3209_v12, %v1242_v59  ;;  %v1372_v15 = vadd.f32 %v3398_v6, %v3396_v26 }
 0x1f4   : > { %2373 = vpow2.f32 %v1330_v57 }
 0x1f5   : > { %v3404_v36 = vpop.eup %2363  ;;  %v1332_v50 = vmul.f32 1.442695, %v1276_v30  ;;  %v1334_v48 = vmul.f32 1.442695, %v1277_v16  ;;  %1373 = vadd.xlane.f32.xlu0 %v1372_v15 }
 0x1f6   : > { %v3406_v60 = vpop.eup %2365  ;;  %v1245_v5 = vpop.xlane.xlu1 %1244 }
 0x1f7   : > { %2375 = vpow2.f32 %v1332_v50  ;;  %v1278_v47 = vsub.f32 %v3221_v62, %v1245_v5  ;;  %v1279_v34 = vsub.f32 %v3227_v7, %v1245_v5  ;;  %v1375_v31 = vadd.f32 %v3406_v60, %v3404_v36 }
 0x1f8   : > { %2377 = vpow2.f32 %v1334_v48 }
 0x1f9   : > { %v3412_v12 = vpop.eup %2367  ;;  %v1336_v44 = vmul.f32 1.442695, %v1278_v47  ;;  %v1338_v20 = vmul.f32 1.442695, %v1279_v34  ;;  %1376 = vadd.xlane.f32.xlu1 %v1375_v31 }
 0x1fa   : > { %v3414_v58 = vpop.eup %2369  ;;  %v1248_v17 = vpop.xlane.xlu0 %1247 }
 0x1fb   : > { %2379 = vpow2.f32 %v1336_v44  ;;  %v1280_v4 = vsub.f32 %v3239_v18, %v1248_v17  ;;  %v1281_v42 = vsub.f32 %v3245_v52, %v1248_v17  ;;  %v1378_v62 = vadd.f32 %v3414_v58, %v3412_v12 }
 0x1fc   : > { %2381 = vpow2.f32 %v1338_v20 }
 0x1fd   : > { %v3420_v7 = vpop.eup %2371  ;;  %v1340_v23 = vmul.f32 1.442695, %v1280_v4  ;;  %v1342_v32 = vmul.f32 1.442695, %v1281_v42  ;;  %1379 = vadd.xlane.f32.xlu0 %v1378_v62 }
 0x1fe   : > { %v3422_v40 = vpop.eup %2373  ;;  %v1251_v35 = vpop.xlane.xlu1 %1250 }
 0x1ff   : > { %2383 = vpow2.f32 %v1340_v23  ;;  %v1282_v41 = vsub.f32 %v3253_v13, %v1251_v35  ;;  %v1283_v54 = vsub.f32 %v3257_v55, %v1251_v35  ;;  %v1381_v52 = vadd.f32 %v3422_v40, %v3420_v7 }
 0x200   : > { %2385 = vpow2.f32 %v1342_v32 }
 0x201   : > { %v3428_v18 = vpop.eup %2375  ;;  %v1344_v37 = vmul.f32 1.442695, %v1282_v41  ;;  %v1346_v57 = vmul.f32 1.442695, %v1283_v54  ;;  %1382 = vadd.xlane.f32.xlu1 %v1381_v52 }
 0x202   : > { %v3430_v59 = vpop.eup %2377 }
 0x203   : > { %2387 = vpow2.f32 %v1344_v37  ;;  %v1384_v30 = vadd.f32 %v3430_v59, %v3428_v18 }
 0x204   : > { %2389 = vpow2.f32 %v1346_v57 }
 0x205   : > { %v3434_v16 = vpop.eup %2379  ;;  %1385 = vadd.xlane.f32.xlu0 %v1384_v30 }
 0x206   : > { %v3436_v55 = vpop.eup %2381 }
 0x207   : > { %v1387_v13 = vadd.f32 %v3436_v55, %v3434_v16 }
 0x209   : > { %v3440_v15 = vpop.eup %2383  ;;  %1388 = vadd.xlane.f32.xlu1 %v1387_v13 }
 0x20a   : > { %v3442_v50 = vpop.eup %2385 }
 0x20b   : > { %v1390_v48 = vadd.f32 %v3442_v50, %v3440_v15 }
 0x20d   : > { %v3446_v5 = vpop.eup %2387  ;;  %1391 = vadd.xlane.f32.xlu0 %v1390_v48 }
 0x20e   : > { %v3448_v47 = vpop.eup %2389 }
 0x20f   : > { %v1393_v34 = vadd.f32 %v3448_v47, %v3446_v5 }
 0x211   : > { %1394 = vadd.xlane.f32.xlu1 %v1393_v34 }
 0x246   : > { %v1045_v31 = vpop.f32.mrb[0].mxu1 }
 0x247   : > { %v1047_v44 = vpop.f32.mrb[1].mxu1  ;;  %2391 = vrcp.f32 %v1045_v31 }
 0x248   : > { %2393 = vrcp.f32 %v1047_v44 }
 0x24a   : > { %v1051_v20 = vpop.f32.mrb[2].mxu1 }
 0x24b   : > { %2395 = vrcp.f32 %v1051_v20  ;;  %v1053_v17 = vpop.f32.mrb[3].mxu1 }
 0x24c   : > { %2397 = vrcp.f32 %v1053_v17 }
 0x24e   : > { %v1057_v4 = vpop.f32.mrb[4].mxu1 }
 0x24f   : > { %v1059_v42 = vpop.f32.mrb[5].mxu1  ;;  %2399 = vrcp.f32 %v1057_v4 }
 0x250   : > { %2401 = vrcp.f32 %v1059_v42 }
 0x251   : > { %v2392_v23 = vpop.eup %2391 }
 0x252   : > { %v1063_v62 = vpop.f32.mrb[6].mxu1  ;;  %v2394_v35 = vpop.eup %2393  ;;  %v3453_v37 = vmul.f32 %v2392_v23, %v3117_v28 }
 0x253   : > { %2403 = vrcp.f32 %v1063_v62  ;;  %v1065_v32 = vpop.f32.mrb[7].mxu1  ;;  %v1173_v13 = vmul.f32 %v2394_v35, %v3105_v46 }
 0x254   : > { %2405 = vrcp.f32 %v1065_v32 }
 0x255   : > { %v2396_v41 = vpop.eup %2395 }
 0x256   : > { %v2398_v54 = vpop.eup %2397  ;;  %v1069_v52 = vpop.f32.mrb[8].mxu1  ;;  %v3456_v57 = vmul.f32 %v2396_v41, %v3121_v11 }
 0x257   : > { %v1071_v30 = vpop.f32.mrb[9].mxu1  ;;  %v1175_v48 = vmul.f32 %v2398_v54, %v3113_v1  ;;  %2407 = vrcp.f32 %v1069_v52 }
 0x258   : > { %v2152_v34 = vpack.c.bf16 %v3456_v57, %v3453_v37  ;;  %2409 = vrcp.f32 %v1071_v30 }
 0x259   : > { %v2150_v31 = vpack.c.bf16 %v1175_v48, %v1173_v13  ;;  %v2400_v20 = vpop.eup %2399 }
 0x25a   : > { %v1075_v44 = vpop.f32.mrb[10].mxu1  ;;  %v2402_v28 = vpop.eup %2401  ;;  %v3463_v46 = vmul.f32 %v2400_v20, %v3143_v63 }
 0x25b   : > { %2411 = vrcp.f32 %v1075_v44  ;;  %v1077_v17 = vpop.f32.mrb[11].mxu1  ;;  %2151 = vmatprep.subr.bf16.mxu1 %v2150_v31  ;;  %v3469_v23 = vmul.f32 %v2402_v28, %v3129_v2 }
 0x25c   : > { %2413 = vrcp.f32 %v1077_v17 }
 0x25d   : > { %v2404_v11 = vpop.eup %2403 }
 0x25e   : > { %v2406_v4 = vpop.eup %2405  ;;  %v1081_v42 = vpop.f32.mrb[12].mxu1  ;;  %v3466_v1 = vmul.f32 %v2404_v11, %v3147_v39 }
 0x25f   : > { %v1083_v62 = vpop.f32.mrb[13].mxu1  ;;  %v3472_v32 = vmul.f32 %v2406_v4, %v3139_v27  ;;  %2415 = vrcp.f32 %v1081_v42 }
 0x260   : > { %v2156_v35 = vpack.c.bf16 %v3466_v1, %v3463_v46  ;;  %2417 = vrcp.f32 %v1083_v62 }
 0x261   : > { %v2154_v41 = vpack.c.bf16 %v3472_v32, %v3469_v23  ;;  %v2408_v52 = vpop.eup %2407 }
 0x262   : > { %v1087_v63 = vpop.f32.mrb[14].mxu1  ;;  %v1350_v54 = vpop.xlane.xlu0 %1349  ;;  %v3479_v31 = vmul.f32 %v2408_v52, %v3161_v49 }
 0x263   : > { %2419 = vrcp.f32 %v1087_v63  ;;  %v1089_v39 = vpop.f32.mrb[15].mxu1  ;;  %v2410_v30 = vpop.eup %2409 }
 0x264   : > { %2421 = vrcp.f32 %v1089_v39  ;;  %v3485_v17 = vmul.f32 %v2410_v30, %v3151_v29  ;;  %v3744_v30 = vld [vmem:[#allocation9_spill] sm:$0xff] }
 0x265   : > { %v2412_v2 = vpop.eup %2411  ;;  %2423 = vrcp.f32 %v1350_v54 }
 0x266   : > { %v2414_v13 = vpop.eup %2413  ;;  %v1093_v27 = vpop.f32.mrb[16].mxu1  ;;  %v3482_v44 = vmul.f32 %v2412_v2, %v3165_v22 }
 0x267   : > { %v1353_v48 = vpop.xlane.xlu1 %1352  ;;  %v1095_v20 = vpop.f32.mrb[17].mxu1  ;;  %v3488_v28 = vmul.f32 %v2414_v13, %v3157_v43  ;;  %2425 = vrcp.f32 %v1093_v27 }
 0x268   : > { %2427 = vrcp.f32 %v1353_v48  ;;  %v3745_v48 = vld [vmem:[#allocation7_spill] sm:$0xff] }
 0x269   : > { %v2158_v4 = vpack.c.bf16 %v3488_v28, %v3485_v17  ;;  %2429 = vrcp.f32 %v1095_v20  ;;  %v2416_v22 = vpop.eup %2415  ;;  %v3746_v17 = vld [vmem:[#allocation8_spill] sm:$0xff] }
 0x26a   : > { %v1099_v49 = vpop.f32.mrb[18].mxu1  ;;  %v1356_v42 = vpop.xlane.xlu0 %1355  ;;  %v3495_v39 = vmul.f32 %v2416_v22, %v3179_v3 }
 0x26b   : > { %2431 = vrcp.f32 %v1099_v49  ;;  %v1101_v62 = vpop.f32.mrb[19].mxu1  ;;  %v2418_v63 = vpop.eup %2417 }
 0x26c   : > { %2433 = vrcp.f32 %v1101_v62  ;;  %v1185_v20 = vmul.f32 %v2418_v63, %v3745_v48  ;;  %v3747_v48 = vld [vmem:[#allocation12_spill] sm:$0xff] }
 0x26d   : > { %v2420_v29 = vpop.eup %2419  ;;  %2435 = vrcp.f32 %v1356_v42 }
 0x26e   : > { %v2422_v43 = vpop.eup %2421  ;;  %v1105_v54 = vpop.f32.mrb[20].mxu1  ;;  %v3498_v2 = vmul.f32 %v2420_v29, %v3744_v30 }
 0x26f   : > { %v1359_v52 = vpop.xlane.xlu1 %1358  ;;  %v2424_v13 = vpop.eup %2423  ;;  %v1187_v28 = vmul.f32 %v2422_v43, %v3746_v17  ;;  %2437 = vrcp.f32 %v1105_v54  ;;  %v3748_v17 = vld [vmem:[#allocation13_spill] sm:$0xff] }
 0x270   : > { %v1107_v27 = vpop.f32.mrb[21].mxu1  ;;  %v1412_v49 = vmul.f32 %v2424_v13, %v3332_v19  ;;  %v1413_v42 = vmul.f32 %v2424_v13, %v3334_v51  ;;  %v2164_v62 = vpack.c.bf16 %v3498_v2, %v3495_v39  ;;  %2439 = vrcp.f32 %v1359_v52 }
 0x271   : > { %v2162_v3 = vpack.c.bf16 %v1187_v28, %v1185_v20  ;;  %v2426_v22 = vpop.eup %2425  ;;  %2441 = vrcp.f32 %v1107_v27 }
 0x272   : > { %v1111_v29 = vpop.f32.mrb[22].mxu1  ;;  %1508 = vmatprep.mubr.f32.mxu1 %v1413_v42  ;;  %v1362_v30 = vpop.xlane.xlu0 %1361  ;;  %v1188_v20 = vmul.f32 %v2426_v22, %v3747_v48 }
 0x273   : > { %v2428_v11 = vpop.eup %2427  ;;  %2443 = vrcp.f32 %v1111_v29  ;;  %v1113_v63 = vpop.f32.mrb[23].mxu1  ;;  %1509 = vmatmul.mubr.f32.vlgmr.msra.gmra.mrb[32].mxu1 %v1412_v49 }
 0x274   : > { %v2430_v43 = vpop.eup %2429  ;;  %2445 = vrcp.f32 %v1113_v63  ;;  %2153 = vmatpush1.bf16.msra.mxu1 %v2152_v34  ;;  %v1415_v19 = vmul.f32 %v2428_v11, %v3342_v56  ;;  %v1414_v51 = vmul.f32 %v2428_v11, %v3340_v38  ;;  %v3749_v56 = vld [vmem:[#allocation10_spill] sm:$0xff]  ;;  %v3750_v38 = vld [vmem:[#allocation11_spill] sm:$0xff] }
 0x275   : > { %v2432_v54 = vpop.eup %2431  ;;  %2447 = vrcp.f32 %v1362_v30  ;;  %2155 = vmatprep.subr.bf16.mxu1 %v2154_v41  ;;  %v1189_v34 = vmul.f32 %v2430_v43, %v3749_v56 }
 0x276   : > { %v2434_v52 = vpop.eup %2433  ;;  %v1117_v13 = vpop.f32.mrb[24].mxu1  ;;  %1513 = vmatprep.mubr.f32.mxu1 %v1415_v19  ;;  %v1190_v28 = vmul.f32 %v2432_v54, %v3748_v17 }
 0x277   : > { %v1365_v27 = vpop.xlane.xlu1 %1364  ;;  %v2436_v37 = vpop.eup %2435  ;;  %1514 = vmatmul.mubr.f32.gmra.mrb[34].mxu1 %v1414_v51  ;;  %v1191_v11 = vmul.f32 %v2434_v52, %v3750_v38  ;;  %2449 = vrcp.f32 %v1117_v13  ;;  %v3752_v51 = vld [vmem:[#allocation16_spill] sm:$0xff]  ;;  %v3753_v52 = vld [vmem:[#allocation17_spill] sm:$0xff] }
 0x278   : > { %v1119_v57 = vpop.f32.mrb[25].mxu1  ;;  %2157 = vmatpush1.bf16.msra.mxu1 %v2156_v35  ;;  %v1417_v23 = vmul.f32 %v2436_v37, %v3350_v45  ;;  %v1416_v32 = vmul.f32 %v2436_v37, %v3348_v9  ;;  %v2168_v41 = vpack.c.bf16 %v1190_v28, %v1188_v20  ;;  %2451 = vrcp.f32 %v1365_v27  ;;  %v3755_v20 = vld [vmem:[#allocation15_spill] sm:$0xff] }
 0x279   : > { %2159 = vmatprep.subr.bf16.mxu1 %v2158_v4  ;;  %v2166_v49 = vpack.c.bf16 %v1191_v11, %v1189_v34  ;;  %v2438_v42 = vpop.eup %2437  ;;  %2453 = vrcp.f32 %v1119_v57  ;;  %v3751_v45 = vpack.c.bf16 %v3482_v44, %v3479_v31  ;;  %v3754_v31 = vld [vmem:[#allocation14_spill] sm:$0xff] }
 0x27a   : > { %v1123_v22 = vpop.f32.mrb[26].mxu1  ;;  %1518 = vmatprep.mubr.f32.mxu1 %v1417_v23  ;;  %v1368_v29 = vpop.xlane.xlu0 %1367  ;;  %v1192_v54 = vmul.f32 %v2438_v42, %v3752_v51  ;;  %v3756_v23 = vld [vmem:[#allocation20_spill] sm:$0xff] }
 0x27b   : > { %v2440_v30 = vpop.eup %2439  ;;  %2455 = vrcp.f32 %v1123_v22  ;;  %v1125_v63 = vpop.f32.mrb[27].mxu1  ;;  %1519 = vmatmul.mubr.f32.gmra.mrb[36].mxu1 %v1416_v32 }
 0x27c   : > { %v2442_v43 = vpop.eup %2441  ;;  %2457 = vrcp.f32 %v1125_v63  ;;  %2161 = vmatpush1.bf16.msra.mxu1 %v3751_v45  ;;  %v1419_v9 = vmul.f32 %v2440_v30, %v3358_v8  ;;  %v1418_v46 = vmul.f32 %v2440_v30, %v3356_v53 }
 0x27d   : > { %v2444_v1 = vpop.eup %2443  ;;  %2459 = vrcp.f32 %v1368_v29  ;;  %2163 = vmatprep.subr.bf16.mxu1 %v2162_v3  ;;  %v1193_v44 = vmul.f32 %v2442_v43, %v3754_v31  ;;  %v3758_v29 = vld [vmem:[#allocation18_spill] sm:$0xff] }
 0x27e   : > { %v2446_v35 = vpop.eup %2445  ;;  %v1129_v4 = vpop.f32.mrb[28].mxu1  ;;  %1523 = vmatprep.mubr.f32.mxu1 %v1419_v9  ;;  %v1194_v13 = vmul.f32 %v2444_v1, %v3753_v52  ;;  %v3762_v31 = vld [vmem:[#allocation22_spill] sm:$0xff] }
 0x27f   : > { %v1371_v19 = vpop.xlane.xlu1 %1370  ;;  %v2448_v27 = vpop.eup %2447  ;;  %1524 = vmatmul.mubr.f32.gmra.mrb[38].mxu1 %v1418_v46  ;;  %v1195_v8 = vmul.f32 %v2446_v35, %v3755_v20  ;;  %2461 = vrcp.f32 %v1129_v4  ;;  %v3763_v20 = vld [vmem:[#allocation6_spill] sm:$0xff] }
 0x280   : > { %v1131_v48 = vpop.f32.mrb[29].mxu1  ;;  %2165 = vmatpush1.bf16.msra.mxu1 %v2164_v62  ;;  %v1421_v53 = vmul.f32 %v2448_v27, %v3366_v0  ;;  %v1420_v3 = vmul.f32 %v2448_v27, %v3364_v33  ;;  %v2172_v17 = vpack.c.bf16 %v1194_v13, %v1192_v54  ;;  %2463 = vrcp.f32 %v1371_v19  ;;  %v3761_v13 = vld [vmem:[#allocation5_spill] sm:$0xff] }
 0x281   : > { %2167 = vmatprep.subr.bf16.mxu1 %v2166_v49  ;;  %v2170_v28 = vpack.c.bf16 %v1195_v8, %v1193_v44  ;;  %v2450_v37 = vpop.eup %2449  ;;  %2465 = vrcp.f32 %v1131_v48  ;;  %v3757_v49 = vld [vmem:[#allocation21_spill] sm:$0xff] }
 0x282   : > { %v1135_v57 = vpop.f32.mrb[30].mxu1  ;;  %1528 = vmatprep.mubr.f32.mxu1 %v1421_v53  ;;  %v1374_v56 = vpop.xlane.xlu0 %1373  ;;  %v1196_v32 = vmul.f32 %v2450_v37, %v3756_v23 }
 0x283   : > { %v2452_v34 = vpop.eup %2451  ;;  %2467 = vrcp.f32 %v1135_v57  ;;  %v1137_v38 = vpop.f32.mrb[31].mxu1  ;;  %1529 = vmatmul.mubr.f32.gmra.mrb[40].mxu1 %v1420_v3 }
 0x284   : > { %v2454_v11 = vpop.eup %2453  ;;  %2469 = vrcp.f32 %v1137_v38  ;;  %2169 = vmatpush1.bf16.msra.mxu1 %v2168_v41  ;;  %v1423_v0 = vmul.f32 %v2452_v34, %v3374_v25  ;;  %v1422_v33 = vmul.f32 %v2452_v34, %v3372_v61  ;;  %v3759_v41 = vld [vmem:[#allocation19_spill] sm:$0xff] }
 0x285   : > { %v2456_v39 = vpop.eup %2455  ;;  %2471 = vrcp.f32 %v1374_v56  ;;  %2171 = vmatprep.subr.bf16.mxu1 %v2170_v28  ;;  %v1197_v30 = vmul.f32 %v2454_v11, %v3758_v29 }
 0x286   : > { %v2458_v2 = vpop.eup %2457  ;;  %1533 = vmatprep.mubr.f32.mxu1 %v1423_v0  ;;  %v1377_v62 = vpop.xlane.xlu1 %1376  ;;  %v1198_v42 = vmul.f32 %v2456_v39, %v3757_v49 }
 0x287   : > { %v2460_v22 = vpop.eup %2459  ;;  %1534 = vmatmul.mubr.f32.gmra.mrb[42].mxu1 %v1422_v33  ;;  %2473 = vrcp.f32 %v1377_v62  ;;  %v1199_v63 = vmul.f32 %v2458_v2, %v3759_v41  ;;  %v2491_v41 = vld [vmem:[%s3698_s6 + $0x10] sm:$0xff] }
 0x288   : > { %2173 = vmatpush1.bf16.msra.mxu1 %v2172_v17  ;;  %v1425_v61 = vmul.f32 %v2460_v22, %v3382_v24  ;;  %v1424_v25 = vmul.f32 %v2460_v22, %v3380_v21  ;;  %v2176_v43 = vpack.c.bf16 %v1198_v42, %v1196_v32  ;;  %v3760_v21 = vld [vmem:[#allocation23_spill] sm:$0xff] }
 0x289   : > { %v2174_v45 = vpack.c.bf16 %v1199_v63, %v1197_v30  ;;  %v2462_v9 = vpop.eup %2461  ;;  %v1591_v63 = vmul.f32 0.17677669, %v2491_v41 }
 0x28a   : > { %1538 = vmatprep.mubr.f32.mxu1 %v1425_v61  ;;  %v1380_v46 = vpop.xlane.xlu0 %1379  ;;  %v2464_v1 = vpop.eup %2463  ;;  %v1200_v52 = vmul.f32 %v2462_v9, %v3760_v21  ;;  %v2494_v21 = vld [vmem:[%s3698_s6 + $0x28] sm:$0xff] }
 0x28b   : > { %1539 = vmatmul.mubr.f32.gmra.mrb[44].mxu1 %v1424_v25  ;;  %2175 = vmatprep.subr.bf16.mxu1 %v2174_v45  ;;  %2475 = vrcp.f32 %v1380_v46  ;;  %v2466_v35 = vpop.eup %2465  ;;  %v1427_v4 = vmul.f32 %v2464_v1, %v3390_v10  ;;  %v1426_v19 = vmul.f32 %v2464_v1, %v3388_v14  ;;  %v2492_v45 = vld [vmem:[%s3698_s6 + $0x18] sm:$0xff] }
 0x28c   : > { %2177 = vmatpush1.bf16.msra.mxu1 %v2176_v43  ;;  %v1201_v44 = vmul.f32 %v2466_v35, %v3762_v31  ;;  %v1592_v9 = vmul.f32 0.17677669, %v2492_v45  ;;  %v2495_v31 = vld [vmem:[%s3698_s6 + $0x30] sm:$0xff] }
 0x28d   : > { %v2468_v51 = vpop.eup %2467  ;;  %1543 = vmatprep.mubr.f32.mxu1 %v1427_v4  ;;  %v2493_v4 = vld [vmem:[%s3698_s6 + $0x20] sm:$0xff] }
 0x28e   : > { %v2470_v54 = vpop.eup %2469  ;;  %v1383_v24 = vpop.xlane.xlu1 %1382  ;;  %v1202_v27 = vmul.f32 %v2468_v51, %v3761_v13 }
 0x28f   : > { %v2472_v48 = vpop.eup %2471  ;;  %1544 = vmatmul.mubr.f32.gmra.mrb[46].mxu1 %v1426_v19  ;;  %2477 = vrcp.f32 %v1383_v24  ;;  %v1203_v8 = vmul.f32 %v2470_v54, %v3763_v20  ;;  %v1593_v19 = vmul.f32 0.17677669, %v2493_v4 }
 0x290   : > { %v1429_v53 = vmul.f32 %v2472_v48, %v3398_v6  ;;  %v1428_v10 = vmul.f32 %v2472_v48, %v3396_v26  ;;  %v2180_v14 = vpack.c.bf16 %v1202_v27, %v1200_v52  ;;  %v1594_v52 = vmul.f32 0.17677669, %v2494_v21 }
 0x291   : > { %v2474_v3 = vpop.eup %2473  ;;  %v2178_v17 = vpack.c.bf16 %v1203_v8, %v1201_v44  ;;  %v1595_v44 = vmul.f32 0.17677669, %v2495_v31 }
 0x292   : > { %1548 = vmatprep.mubr.f32.mxu1 %v1429_v53  ;;  %v1386_v28 = vpop.xlane.xlu0 %1385  ;;  %v1431_v37 = vmul.f32 %v2474_v3, %v3406_v60  ;;  %v1430_v57 = vmul.f32 %v2474_v3, %v3404_v36 }
 0x293   : > { %1549 = vmatmul.mubr.f32.gmra.mrb[48].mxu1 %v1428_v10  ;;  %2179 = vmatprep.subr.bf16.mxu1 %v2178_v17  ;;  %2479 = vrcp.f32 %v1386_v28  ;;  %v2496_v10 = vld [vmem:[%s3698_s6 + $0x38] sm:$0xff] }
 0x294   : > { %2181 = vmatpush1.bf16.msra.mxu1 %v2180_v14  ;;  %1553 = vmatprep.mubr.f32.mxu1 %v1431_v37  ;;  %v1596_v14 = vmul.f32 0.17677669, %v2496_v10  ;;  %v2497_v37 = vld [vmem:[%s3698_s6 + $0x40] sm:$0xff] }
 0x295   : > { %v2476_v56 = vpop.eup %2475 }
 0x296   : > { %v1389_v34 = vpop.xlane.xlu1 %1388  ;;  %v1433_v6 = vmul.f32 %v2476_v56, %v3414_v58  ;;  %v1432_v26 = vmul.f32 %v2476_v56, %v3412_v12 }
 0x297   : > { %1554 = vmatmul.mubr.f32.gmra.mrb[50].mxu1 %v1430_v57  ;;  %2481 = vrcp.f32 %v1389_v34  ;;  %v1597_v57 = vmul.f32 0.17677669, %v2497_v37 }
 0x298   : > { %1558 = vmatprep.mubr.f32.mxu1 %v1433_v6 }
 0x299   : > { %v2478_v38 = vpop.eup %2477 }
 0x29a   : > { %v1392_v11 = vpop.xlane.xlu0 %1391  ;;  %v1435_v60 = vmul.f32 %v2478_v38, %v3422_v40  ;;  %v1434_v0 = vmul.f32 %v2478_v38, %v3420_v7 }
 0x29b   : > { %1559 = vmatmul.mubr.f32.gmra.mrb[52].mxu1 %v1432_v26  ;;  %2483 = vrcp.f32 %v1392_v11  ;;  %v2498_v26 = vld [vmem:[%s3698_s6 + $0x48] sm:$0xff] }
 0x29c   : > { %1563 = vmatprep.mubr.f32.mxu1 %v1435_v60  ;;  %v1598_v38 = vmul.f32 0.17677669, %v2498_v26 }
 0x29d   : > { %v2480_v36 = vpop.eup %2479 }
 0x29e   : > { %v1395_v33 = vpop.xlane.xlu1 %1394  ;;  %v1437_v39 = vmul.f32 %v2480_v36, %v3430_v59  ;;  %v1436_v58 = vmul.f32 %v2480_v36, %v3428_v18  ;;  %v2499_v36 = vld [vmem:[%s3698_s6 + $0x50] sm:$0xff] }
 0x29f   : > { %1564 = vmatmul.mubr.f32.gmra.mrb[54].mxu1 %v1434_v0  ;;  %2485 = vrcp.f32 %v1395_v33  ;;  %v1599_v33 = vmul.f32 0.17677669, %v2499_v36 }
 0x2a0   : > { %1568 = vmatprep.mubr.f32.mxu1 %v1437_v39 }
 0x2a1   : > { %v2482_v12 = vpop.eup %2481 }
 0x2a2   : > { %v1439_v2 = vmul.f32 %v2482_v12, %v3436_v55  ;;  %v1438_v40 = vmul.f32 %v2482_v12, %v3434_v16  ;;  %v3764_v55 = vmov 0.0   ;;  %v2489_v16 = vld [vmem:[%s3698_s6] sm:$0xff] }
 0x2a3   : > { %1569 = vmatmul.mubr.f32.gmra.mrb[56].mxu1 %v1436_v58  ;;  %v1589_v49 = vmul.f32 0.17677669, %v2489_v16 }
 0x2a4   : > { %1573 = vmatprep.mubr.f32.mxu1 %v1439_v2  ;;  %v2500_v2 = vld [vmem:[%s3698_s6 + $0x58] sm:$0xff] }
 0x2a5   : > { %v2484_v62 = vpop.eup %2483 }
 0x2a6   : > { %v1441_v7 = vmul.f32 %v2484_v62, %v3442_v50  ;;  %v1440_v23 = vmul.f32 %v2484_v62, %v3440_v15  ;;  %v2490_v15 = vld [vmem:[%s3698_s6 + $0x8] sm:$0xff] }
 0x2a7   : > { %1574 = vmatmul.mubr.f32.gmra.mrb[58].mxu1 %v1438_v40  ;;  %v1600_v40 = vmul.f32 0.17677669, %v2500_v2 }
 0x2a8   : > { %1578 = vmatprep.mubr.f32.mxu1 %v1441_v7 }
 0x2a9   : > { %v2486_v59 = vpop.eup %2485 }
 0x2aa   : > { %v1443_v32 = vmul.f32 %v2486_v59, %v3448_v47  ;;  %v1442_v18 = vmul.f32 %v2486_v59, %v3446_v5  ;;  %v1590_v47 = vmul.f32 0.17677669, %v2490_v15  ;;  %v2501_v59 = vld [vmem:[%s3698_s6 + $0x60] sm:$0xff] }
 0x2ab   : > { %1579 = vmatmul.mubr.f32.gmra.mrb[60].mxu1 %v1440_v23 }
 0x2ac   : > { %1583 = vmatprep.mubr.f32.mxu1 %v1443_v32  ;;  %v1601_v32 = vmul.f32 0.17677669, %v2501_v59 }
 0x2af   : > { %1584 = vmatmul.mubr.f32.gmra.mrb[62].mxu1 %v1442_v18 }
 0x2b0   : > { %1717 = vmatprep.mubr.f32.mxu1 %v3764_v55 }
 0x346   : > { %v1510_v50 = vpop.f32.mrb[32].mxu1 }
 0x347   : > { %v1605_v42 = vmul.f32 %v1589_v49, %v1510_v50  ;;  %v1512_v22 = vpop.f32.mrb[33].mxu1  ;;  %v2502_v50 = vld [vmem:[%s3698_s6 + $0x68] sm:$0xff] }
 0x349   : > { %1621 = vxpose.xlu0.b32.start [1/16] %v1605_v42, 128  ;;  %v1602_v42 = vmul.f32 0.17677669, %v2502_v50 }
 0x34a   : > { %v1515_v29 = vpop.f32.mrb[34].mxu1 }
 0x34b   : > { %v1606_v5 = vmul.f32 %v1590_v47, %v1515_v29  ;;  %v1517_v30 = vpop.f32.mrb[35].mxu1  ;;  %v2503_v29 = vld [vmem:[%s3698_s6 + $0x70] sm:$0xff] }
 0x34d   : > { %1622 = vxpose.xlu0.b32.cont [2/16] %v1606_v5, 128  ;;  %v1603_v5 = vmul.f32 0.17677669, %v2503_v29 }
 0x34e   : > { %v1520_v61 = vpop.f32.mrb[36].mxu1 }
 0x34f   : > { %v1607_v25 = vmul.f32 %v1591_v63, %v1520_v61  ;;  %v1522_v43 = vpop.f32.mrb[37].mxu1  ;;  %v2504_v61 = vld [vmem:[%s3698_s6 + $0x78] sm:$0xff] }
 0x351   : > { %1623 = vxpose.xlu0.b32.cont [3/16] %v1607_v25, 128  ;;  %v1604_v25 = vmul.f32 0.17677669, %v2504_v61 }
 0x352   : > { %v1525_v46 = vpop.f32.mrb[38].mxu1 }
 0x353   : > { %v1608_v1 = vmul.f32 %v1592_v9, %v1525_v46  ;;  %v1527_v35 = vpop.f32.mrb[39].mxu1 }
 0x355   : > { %1624 = vxpose.xlu0.b32.cont [4/16] %v1608_v1, 128 }
 0x356   : > { %v1530_v51 = vpop.f32.mrb[40].mxu1 }
 0x357   : > { %v1609_v54 = vmul.f32 %v1593_v19, %v1530_v51  ;;  %v1532_v24 = vpop.f32.mrb[41].mxu1 }
 0x359   : > { %1625 = vxpose.xlu0.b32.cont [5/16] %v1609_v54, 128 }
 0x35a   : > { %v1535_v13 = vpop.f32.mrb[42].mxu1 }
 0x35b   : > { %v1610_v27 = vmul.f32 %v1594_v52, %v1535_v13  ;;  %v1537_v48 = vpop.f32.mrb[43].mxu1 }
 0x35d   : > { %1626 = vxpose.xlu0.b32.cont [6/16] %v1610_v27, 128 }
 0x35e   : > { %v1540_v20 = vpop.f32.mrb[44].mxu1 }
 0x35f   : > { %v1611_v8 = vmul.f32 %v1595_v44, %v1540_v20  ;;  %v1542_v53 = vpop.f32.mrb[45].mxu1 }
 0x360   : > { %v2572_v53 = vmov 0  }
 0x361   : > { %1627 = vxpose.xlu0.b32.cont [7/16] %v1611_v8, 128  ;;  %v1815_v8 = vld [vmem:[%s3695_s3] sm:$0xff]  ;;  %2261 = vset.pattern.permute.xlu1 %v2572_v53 }
 0x362   : > { %v1545_v3 = vpop.f32.mrb[46].mxu1  ;;  %1818 = vperm.xlu1 %2261, %v1815_v8  }
 0x363   : > { %v1612_v17 = vmul.f32 %v1596_v14, %v1545_v3  ;;  %v1547_v28 = vpop.f32.mrb[47].mxu1 }
 0x365   : > { %1628 = vxpose.xlu0.b32.cont [8/16] %v1612_v17, 128 }
 0x366   : > { %v1550_v56 = vpop.f32.mrb[48].mxu1 }
 0x367   : > { %v1613_v34 = vmul.f32 %v1597_v57, %v1550_v56  ;;  %v1552_v6 = vpop.f32.mrb[49].mxu1 }
 0x369   : > { %1629 = vxpose.xlu0.b32.cont [9/16] %v1613_v34, 128 }
 0x36a   : > { %v1555_v11 = vpop.f32.mrb[50].mxu1 }
 0x36b   : > { %v1614_v60 = vmul.f32 %v1598_v38, %v1555_v11  ;;  %v1557_v0 = vpop.f32.mrb[51].mxu1 }
 0x36d   : > { %1630 = vxpose.xlu0.b32.cont [10/16] %v1614_v60, 128 }
 0x36e   : > { %v1560_v39 = vpop.f32.mrb[52].mxu1 }
 0x36f   : > { %v1615_v58 = vmul.f32 %v1599_v33, %v1560_v39  ;;  %v1562_v12 = vpop.f32.mrb[53].mxu1 }
 0x371   : > { %1631 = vxpose.xlu0.b32.cont [11/16] %v1615_v58, 128 }
 0x372   : > { %v1565_v62 = vpop.f32.mrb[54].mxu1 }
 0x373   : > { %v1616_v7 = vmul.f32 %v1600_v40, %v1565_v62  ;;  %v1567_v23 = vpop.f32.mrb[55].mxu1 }
 0x375   : > { %1632 = vxpose.xlu0.b32.cont [12/16] %v1616_v7, 128 }
 0x376   : > { %v1570_v18 = vpop.f32.mrb[56].mxu1 }
 0x377   : > { %v1617_v16 = vmul.f32 %v1601_v32, %v1570_v18  ;;  %v1572_v49 = vpop.f32.mrb[57].mxu1 }
 0x379   : > { %1633 = vxpose.xlu0.b32.cont [13/16] %v1617_v16, 128 }
 0x37a   : > { %v1575_v22 = vpop.f32.mrb[58].mxu1 }
 0x37b   : > { %v1618_v15 = vmul.f32 %v1602_v42, %v1575_v22  ;;  %v1577_v47 = vpop.f32.mrb[59].mxu1 }
 0x37d   : > { %1634 = vxpose.xlu0.b32.cont [14/16] %v1618_v15, 128 }
 0x37e   : > { %v1580_v30 = vpop.f32.mrb[60].mxu1 }
 0x37f   : > { %v1619_v41 = vmul.f32 %v1603_v5, %v1580_v30  ;;  %v1582_v63 = vpop.f32.mrb[61].mxu1 }
 0x381   : > { %1635 = vxpose.xlu0.b32.cont [15/16] %v1619_v41, 128 }
 0x382   : > { %v1585_v43 = vpop.f32.mrb[62].mxu1 }
 0x383   : > { %v1620_v45 = vmul.f32 %v1604_v25, %v1585_v43  ;;  %v1587_v9 = vpop.f32.mrb[63].mxu1 }
 0x385   : > { %1636 = vxpose.xlu0.b32.end [16/16] %v1620_v45, 128 }
 0x3ae   : > { %2262 = vset.pattern.permute.xlu0 %v2572_v53 }
 0x3c9   : > { %v1637_v46 = vpop.trf.xlu0 }
 0x3ca   : > { %1718 = vmatmul.mubr.f32.vlgmr.msra.gmra.mrb[64].mxu1 %v1637_v46 }
 0x3cb   : > { %1723 = vmatprep.mubr.f32.mxu1 %v3764_v55 }
 0x3cd   : > { %v1638_v1 = vpop.trf.xlu0 }
 0x3ce   : > { %1724 = vmatmul.mubr.f32.gmra.mrb[66].mxu1 %v1638_v1 }
 0x3cf   : > { %1729 = vmatprep.mubr.f32.mxu1 %v3764_v55 }
 0x3d1   : > { %v1639_v35 = vpop.trf.xlu0 }
 0x3d2   : > { %1730 = vmatmul.mubr.f32.gmra.mrb[68].mxu1 %v1639_v35  ;;  %v1814_v35 = vld [vmem:[%s3694_s2] sm:$0xff] }
 0x3d3   : > { %1735 = vmatprep.mubr.f32.mxu1 %v3764_v55 }
 0x3d5   : > { %v1640_v4 = vpop.trf.xlu0 }
 0x3d6   : > { %1736 = vmatmul.mubr.f32.gmra.mrb[70].mxu1 %v1640_v4 }
 0x3d7   : > { %1741 = vmatprep.mubr.f32.mxu1 %v3764_v55 }
 0x3d9   : > { %v1641_v19 = vpop.trf.xlu0 }
 0x3da   : > { %1742 = vmatmul.mubr.f32.gmra.mrb[72].mxu1 %v1641_v19 }
 0x3db   : > { %1747 = vmatprep.mubr.f32.mxu1 %v3764_v55 }
 0x3dd   : > { %v1642_v51 = vpop.trf.xlu0 }
 0x3de   : > { %1748 = vmatmul.mubr.f32.gmra.mrb[74].mxu1 %v1642_v51 }
 0x3df   : > { %1753 = vmatprep.mubr.f32.mxu1 %v3764_v55 }
 0x3e1   : > { %v1643_v54 = vpop.trf.xlu0  ;;  %v1819_v4 = vpop.permute.xlu1 %1818 }
 0x3e2   : > { %1754 = vmatmul.mubr.f32.gmra.mrb[76].mxu1 %v1643_v54 }
 0x3e3   : > { %1759 = vmatprep.mubr.f32.mxu1 %v3764_v55 }
 0x3e5   : > { %v1644_v24 = vpop.trf.xlu0 }
 0x3e6   : > { %1760 = vmatmul.mubr.f32.gmra.mrb[78].mxu1 %v1644_v24 }
 0x3e7   : > { %1765 = vmatprep.mubr.f32.mxu1 %v3764_v55 }
 0x3e9   : > { %v1645_v21 = vpop.trf.xlu0 }
 0x3ea   : > { %1766 = vmatmul.mubr.f32.gmra.mrb[80].mxu1 %v1645_v21 }
 0x3eb   : > { %1771 = vmatprep.mubr.f32.mxu1 %v3764_v55 }
 0x3ed   : > { %v1646_v52 = vpop.trf.xlu0 }
 0x3ee   : > { %1772 = vmatmul.mubr.f32.gmra.mrb[82].mxu1 %v1646_v52 }
 0x3ef   : > { %1777 = vmatprep.mubr.f32.mxu1 %v3764_v55 }
 0x3f1   : > { %v1647_v13 = vpop.trf.xlu0 }
 0x3f2   : > { %1778 = vmatmul.mubr.f32.gmra.mrb[84].mxu1 %v1647_v13 }
 0x3f3   : > { %1783 = vmatprep.mubr.f32.mxu1 %v3764_v55 }
 0x3f5   : > { %v1648_v27 = vpop.trf.xlu0 }
 0x3f6   : > { %1784 = vmatmul.mubr.f32.gmra.mrb[86].mxu1 %v1648_v27 }
 0x3f7   : > { %1789 = vmatprep.mubr.f32.mxu1 %v3764_v55 }
 0x3f9   : > { %v1649_v48 = vpop.trf.xlu0 }
 0x3fa   : > { %1790 = vmatmul.mubr.f32.gmra.mrb[88].mxu1 %v1649_v48 }
 0x3fb   : > { %1795 = vmatprep.mubr.f32.mxu1 %v3764_v55 }
 0x3fd   : > { %v1650_v31 = vpop.trf.xlu0 }
 0x3fe   : > { %1796 = vmatmul.mubr.f32.gmra.mrb[90].mxu1 %v1650_v31 }
 0x3ff   : > { %1801 = vmatprep.mubr.f32.mxu1 %v3764_v55 }
 0x401   : > { %v1651_v44 = vpop.trf.xlu0 }
 0x402   : > { %1802 = vmatmul.mubr.f32.gmra.mrb[92].mxu1 %v1651_v44 }
 0x403   : > { %1807 = vmatprep.mubr.f32.mxu1 %v3764_v55 }
 0x405   : > { %v1652_v20 = vpop.trf.xlu0 }
 0x406   : > { %1808 = vmatmul.mubr.f32.gmra.mrb[94].mxu1 %v1652_v20 }
 0x49d   : > { %v1719_v10 = vpop.f32.mrb[64].mxu1 }
 0x49e   : > { %v1721_v14 = vpop.f32.mrb[65].mxu1 }
 0x4a1   : > { %v1725_v3 = vpop.f32.mrb[66].mxu1 }
 0x4a2   : > { %v2184_v17 = vpack.c.bf16 %v1725_v3, %v1719_v10  ;;  %v1727_v28 = vpop.f32.mrb[67].mxu1 }
 0x4a3   : > { %v2182_v37 = vpack.c.bf16 %v1727_v28, %v1721_v14  ;;  %v1930_v28 = vld [vmem:[%s3696_s4] sm:$0xff] }
 0x4a5   : > { %2183 = vmatprep.subr.bf16.mxu0 %v2182_v37  ;;  %v1731_v57 = vpop.f32.mrb[68].mxu1  ;;  %v1938_v37 = vld [vmem:[%s3697_s5] sm:$0xff] }
 0x4a6   : > { %2185 = vmatpush1.bf16.msra.mxu0 %v2184_v17  ;;  %v1733_v55 = vpop.f32.mrb[69].mxu1 }
 0x4a9   : > { %v1737_v56 = vpop.f32.mrb[70].mxu1 }
 0x4aa   : > { %v2188_v34 = vpack.c.bf16 %v1737_v56, %v1731_v57  ;;  %v1739_v6 = vpop.f32.mrb[71].mxu1 }
 0x4ab   : > { %v2186_v26 = vpack.c.bf16 %v1739_v6, %v1733_v55 }
 0x4ad   : > { %2187 = vmatprep.subr.bf16.mxu0 %v2186_v26  ;;  %v1743_v38 = vpop.f32.mrb[72].mxu1 }
 0x4ae   : > { %2189 = vmatpush1.bf16.msra.mxu0 %v2188_v34  ;;  %v1745_v11 = vpop.f32.mrb[73].mxu1 }
 0x4b1   : > { %v1749_v60 = vpop.f32.mrb[74].mxu1 }
 0x4b2   : > { %v2192_v0 = vpack.c.bf16 %v1749_v60, %v1743_v38  ;;  %v1751_v36 = vpop.f32.mrb[75].mxu1 }
 0x4b3   : > { %v2190_v33 = vpack.c.bf16 %v1751_v36, %v1745_v11 }
 0x4b5   : > { %v1755_v39 = vpop.f32.mrb[76].mxu1  ;;  %2191 = vmatprep.subr.bf16.mxu0 %v2190_v33 }
 0x4b6   : > { %v1757_v58 = vpop.f32.mrb[77].mxu1  ;;  %2193 = vmatpush1.bf16.msra.mxu0 %v2192_v0 }
 0x4b9   : > { %v1761_v12 = vpop.f32.mrb[78].mxu1 }
 0x4ba   : > { %v2196_v2 = vpack.c.bf16 %v1761_v12, %v1755_v39  ;;  %v1763_v40 = vpop.f32.mrb[79].mxu1 }
 0x4bb   : > { %v2194_v62 = vpack.c.bf16 %v1763_v40, %v1757_v58 }
 0x4bd   : > { %v1767_v7 = vpop.f32.mrb[80].mxu1  ;;  %2195 = vmatprep.subr.bf16.mxu0 %v2194_v62 }
 0x4be   : > { %v1769_v23 = vpop.f32.mrb[81].mxu1  ;;  %2197 = vmatpush1.bf16.msra.mxu0 %v2196_v2 }
 0x4c1   : > { %v1773_v59 = vpop.f32.mrb[82].mxu1 }
 0x4c2   : > { %v2200_v32 = vpack.c.bf16 %v1773_v59, %v1767_v7  ;;  %v1775_v18 = vpop.f32.mrb[83].mxu1  ;;  %v2505_v7 = vld [vmem:[%s2669_s17] sm:$0xff]  ;;  %v2506_v59 = vld [vmem:[%s2669_s17 + $0x8] sm:$0xff]  ;;  %s2573_s17 = smov [#allocation2]  }
 0x4c3   : > { %v2198_v16 = vpack.c.bf16 %v1775_v18, %v1769_v23 }
 0x4c5   : > { %v1779_v49 = vpop.f32.mrb[84].mxu1  ;;  %2199 = vmatprep.subr.bf16.mxu0 %v2198_v16 }
 0x4c6   : > { %v1781_v50 = vpop.f32.mrb[85].mxu1  ;;  %2201 = vmatpush1.bf16.msra.mxu0 %v2200_v32 }
 0x4c9   : > { %v1785_v42 = vpop.f32.mrb[86].mxu1 }
 0x4ca   : > { %v2204_v22 = vpack.c.bf16 %v1785_v42, %v1779_v49  ;;  %v1787_v15 = vpop.f32.mrb[87].mxu1 }
 0x4cb   : > { %v2202_v47 = vpack.c.bf16 %v1787_v15, %v1781_v50 }
 0x4cd   : > { %v1791_v29 = vpop.f32.mrb[88].mxu1  ;;  %2203 = vmatprep.subr.bf16.mxu0 %v2202_v47 }
 0x4ce   : > { %v1793_v5 = vpop.f32.mrb[89].mxu1  ;;  %2205 = vmatpush1.bf16.msra.mxu0 %v2204_v22 }
 0x4d1   : > { %v1797_v30 = vpop.f32.mrb[90].mxu1 }
 0x4d2   : > { %v2208_v41 = vpack.c.bf16 %v1797_v30, %v1791_v29  ;;  %v1799_v63 = vpop.f32.mrb[91].mxu1 }
 0x4d3   : > { %v2206_v61 = vpack.c.bf16 %v1799_v63, %v1793_v5 }
 0x4d5   : > { %v1803_v25 = vpop.f32.mrb[92].mxu1  ;;  %2207 = vmatprep.subr.bf16.mxu0 %v2206_v61 }
 0x4d6   : > { %v1805_v43 = vpop.f32.mrb[93].mxu1  ;;  %2209 = vmatpush1.bf16.msra.mxu0 %v2208_v41 }
 0x4d9   : > { %v1809_v45 = vpop.f32.mrb[94].mxu1 }
 0x4da   : > { %v2212_v9 = vpack.c.bf16 %v1809_v45, %v1803_v25  ;;  %v1811_v46 = vpop.f32.mrb[95].mxu1 }
 0x4db   : > { %v2210_v1 = vpack.c.bf16 %v1811_v46, %v1805_v43 }
 0x4dd   : > { %2211 = vmatprep.subr.bf16.mxu0 %v2210_v1 }
 0x4de   : > { %2213 = vmatpush1.bf16.msra.mxu0 %v2212_v9 }
 0x4e1   : > { %1886 = vmatmul.mubr.f32.vlgmr.msra.gmra.mrb[96].mxu0 %v1814_v35 }
 0x5b4   : > { %v1887_v19 = vpop.f32.mrb[96].mxu0 }
 0x5b5   : > { %v1888_v51 = vadd.f32 %v1887_v19, %v1819_v4  ;;  %v1889_v54 = vpop.f32.mrb[97].mxu0 }
 0x5b6   : > { %v1890_v24 = vadd.f32 %v1889_v54, %v1819_v4 }
 0x5b8   : > { %v1892_v21 = vadd.f32 %v1890_v24, %v1888_v51 }
 0x5ba   : > { %1893 = vadd.xlane.f32.xlu1 %v1892_v21 }
 0x647   : > { %v1894_v52 = vpop.xlane.xlu1 %1893 }
 0x648   : > { %v1895_v13 = vrot.slane %v1894_v52, 4 }
 0x64a   : > { %v1896_v27 = vadd.f32 %v1895_v13, %v1894_v52 }
 0x64c   : > { %v1897_v48 = vrot.slane %v1896_v27, 2 }
 0x64e   : > { %v1898_v31 = vadd.f32 %v1897_v48, %v1896_v27 }
 0x650   : > { %v1899_v44 = vrot.slane %v1898_v31, 1 }
 0x652   : > { %v1900_v20 = vadd.f32 %v1899_v44, %v1898_v31 }
 0x654   : > { %2214 = vpush %v1900_v20 }
 0x685   : > { %s2215_s9 = spop %2214 }
 0x686   : > { %s1904_s13 = smul.f32 0.00048828125, %s2215_s9  ;;  %s271_s9 = scalar_lea.vmem [#allocation2], %s2028_s23 }
 0x688   : > { %v1905_v8 = vstv %s1904_s13  ;;  %s1965_s13 = sshll.u32 %s271_s9, 4  ;;  %s3652_s13 = int_to_ptr.vmem [resolvable:$true] %s1965_s13 }
 0x689   : > { %v1906_v53 = vsub.f32 %v1888_v51, %v1905_v8  ;;  %v1907_v10 = vsub.f32 %v1890_v24, %v1905_v8  ;;  %s2507_s18 = scalar_lea.vmem %s3652_s13, 256 }
 0x68a   : > { %p2508_p11 = scmp.ne.s32.totalorder %s3652_s13, %s2507_s18 }
 0x68b   : > { %v1908_v14 = vmul.f32 %v1906_v53, %v1906_v53  ;;  %v1909_v3 = vmul.f32 %v1907_v10, %v1907_v10 }
 0x68c   : > { %p2509_p12 = pnand %p2508_p11, %p2652_p5 }
 0x68d   : > { %v1910_v17 = vadd.f32 %v1909_v3, %v1908_v14 }
 0x68e   : > { %p2510_p13 = pneg %p2509_p12 }
 0x68f   : > { %1911 = vadd.xlane.f32.xlu1 %v1910_v17 }
 0x6a0   : > { %1933 = vperm.xlu1 %2261, %v1930_v28  }
 0x6a4   : > { %1941 = vperm.xlu1 %2261, %v1938_v37  }
 0x71c   : > { %v1912_v57 = vpop.xlane.xlu1 %1911 }
 0x71d   : > { %v1913_v55 = vrot.slane %v1912_v57, 4 }
 0x71f   : > { %v1914_v56 = vadd.f32 %v1913_v55, %v1912_v57 }
 0x720   : > { %v1934_v0 = vpop.permute.xlu1 %1933 }
 0x721   : > { %v1915_v34 = vrot.slane %v1914_v56, 2 }
 0x723   : > { %v1916_v6 = vadd.f32 %v1915_v34, %v1914_v56 }
 0x724   : > { %v1942_v2 = vpop.permute.xlu1 %1941 }
 0x725   : > { %v1917_v26 = vrot.slane %v1916_v6, 1 }
 0x727   : > { %v1918_v38 = vadd.f32 %v1917_v26, %v1916_v6 }
 0x729   : > { %2216 = vpush %v1918_v38 }
 0x75a   : > { %s2217_s19 = spop %2216 }
 0x75b   : > { %s1922_s20 = smul.f32 0.00048828125, %s2217_s19  ;;  %s2511_s19 = sshll.u32 %s2573_s17, 4  ;;  %s2512_s19 = int_to_ptr.vmem [resolvable:$false] %s2511_s19 }
 0x75c   : > { %p2514_p0 = scmp.lt.s32.totalorder %s3652_s13, %s2512_s19 }
 0x75d   : > { %s1923_s21 = sadd.f32 1e-05, %s1922_s20  ;;  %s2513_s20 = scalar_lea.vmem %s2512_s19, 512 }
 0x75e   : > { %p2515_p1 = scmp.lt.s32.totalorder %s2513_s20, %s2507_s18 }
 0x75f   : > { %v1924_v11 = vstv %s1923_s21 }
 0x760   : > { %2487 = vrsqrt.f32 %v1924_v11  ;;  %p2516_p2 = por %p2515_p1, %p2514_p0 }
 0x762   : > { %p2517_p3 = pnand %p2516_p2, %p2510_p13 }
 0x76a   : > { %v2488_v60 = vpop.eup %2487 }
 0x76b   : > { %2218 = vpush %v2488_v60 }
 0x79c   : > { %s2219_s29 = spop %2218 }
 0x79d   : > { %v1927_v36 = vstv %s2219_s29 }
 0x79e   : > { %v1928_v33 = vmul.f32 %v1927_v36, %v1906_v53  ;;  %v1929_v39 = vmul.f32 %v1927_v36, %v1907_v10 }
 0x7a0   : > { %v1936_v58 = vmul.f32 %v1934_v0, %v1928_v33  ;;  %v1937_v12 = vmul.f32 %v1934_v0, %v1929_v39 }
 0x7a2   : > { %v1944_v40 = vadd.f32 %v1942_v2, %v1936_v58  ;;  %v1945_v62 = vadd.f32 %v1942_v2, %v1937_v12 }
 0x7a4   : > { %v1946_v23 = vadd.f32 %v2505_v7, %v1944_v40  ;;  %v1947_v32 = vadd.f32 %v2506_v59, %v1945_v62 }
 0x7a6   : > { %1948 = vst [vmem:[%s271_s9] sm:$0xff] %v1946_v23  ;;  %1949 = vst [vmem:[%s271_s9 + $0x8] sm:$0xff] %v1947_v32 }
 0x7a7   : > { %2520 = shalt.err (!%p2517_p3)
}
 0x7a8   : > { %s2521_s21 = scalar_lea.hbm %s3650_s16, 256  ;;  %s2525_s29 = scalar_lea.hbm %s3699_s7, 512 }
 0x7a9   : > { %p2522_p4 = scmp.ne.s32.totalorder %s3650_s16, %s2521_s21  ;;  %p2526_p9 = scmp.lt.u32.totalorder %s3650_s16, %s3699_s7 }
 0x7aa   : > { %p2527_p10 = scmp.lt.u32.totalorder %s2525_s29, %s2521_s21  ;;  %p2529_p12 = scmp.lt.u32.totalorder %s2521_s21, %s3650_s16 }
 0x7ab   : > { %p2523_p7 = pnand %p2522_p4, %p2652_p5 }
 0x7ac   : > { %p2528_p11 = por %p2527_p10, %p2526_p9 }
 0x7ad   : > { %p2524_p8 = pneg %p2523_p7 }
 0x7ae   : > { %p2530_p13 = por %p2529_p12, %p2528_p11 }
 0x7b0   : > { %p2531_p0 = pnand %p2530_p13, %p2524_p8 }
 0x7b2   : > { %2534 = shalt.err (!%p2531_p0)
}
 0x7b3   : > { %2220 = dma.vmem_to_hbm [thread:$0]  (%p2652_p5), %s3652_s13, 256, %s3650_s16, %s1951_s28  }
 0x7b4 PF: > { %p2226_p1 = scmp.ge.s32.totalorder %s2569_s27, 2  ;;  %s1977_s14 = sand.u32 1, %s2557_s24  }
 0x7b5   : > { %s1978_s15 = scalar_lea.sflag [#allocation3], %s1977_s14 }
 0x7b6   : > { %p2223_p2 = pnand %p2226_p1, %p2656_p6 }
 0x7b8   : > { %2552 = dma.done.wait (!%p2223_p2), %s1978_s15, 256  }
 0x7b9   : > { %2554 = vsyncadd (!%p2223_p2), %s1978_s15, 4294967040  ;;  %p17_p3 = scmp.ge.s32.totalorder %s2639_s30, 4   ;;  %s3765_s24 = smov %s2561_s25 }
 0x7ba   : > { %s3766_s25 = smov %s2565_s26  ;;  %s3767_s26 = smov %s2650_s10 }
 0x7bb   : > { %s3768_s27 = smov %s2639_s30  ;;  %19 = sbr.rel (!%p17_p3) target bundleno = 3 (0x3), region = 83 }
 0x7c2   :  { %1983 = vsyncpa [#allocation3], 1 }
 0x7c3   :  { %1985 = vsyncpa [#allocation3 + $0x1], 1 }

</bundles_post_ra>
